<compile_context>
chip_gen: v6e
topology: v6e:2x2x1
jax: 0.10.0
libtpu: 0.0.40
codegen_flags: <defaults>
</compile_context>

<pallas_src>
import jax
import jax.numpy as jnp
from jax.experimental import pallas as pl
from jax.experimental.pallas import tpu as pltpu


_CONV_ROW_TILE = 512   # pooled-output rows per grid step (multiple of 16)
_FC_ROW_TILE = 256     # batch rows per grid step for the fused FC stack


# ----------------------------------------------------------------------------
# Pallas kernels
# ----------------------------------------------------------------------------
def conv_relu_pool_kernel(p_ref, w_ref, b_ref, o_ref):
    """Fused conv(as matmul) + 2x2 max-pool + bias + ReLU.

    p_ref: (4, TM, K) bf16 -- im2col patches for the 4 positions of each 2x2
                              pool window (TM pooled rows, K = 9*Cin)
    w_ref: (K, Cout)  bf16
    b_ref: (1, Cout)  f32
    o_ref: (TM, Cout) bf16
    """
    w = w_ref[...]
    tm = p_ref.shape[1]

    if tm % 16 == 0:
        # Production path: one large MXU dot instead of 4 small ones
        # (amortizes MXU weight-push / result-drain; K is tiny here).
        p = jnp.concatenate([p_ref[0], p_ref[1], p_ref[2], p_ref[3]], axis=0)
        y = jnp.dot(p, w, preferred_element_type=jnp.float32)   # (4*TM, Cout)
        m = jnp.maximum(jnp.maximum(y[0:tm], y[tm:2 * tm]),
                        jnp.maximum(y[2 * tm:3 * tm], y[3 * tm:4 * tm]))
    else:
        # Small / sublane-unaligned tile (tiny test batches): 4 plain 2-D dots.
        y0 = jnp.dot(p_ref[0], w, preferred_element_type=jnp.float32)
        y1 = jnp.dot(p_ref[1], w, preferred_element_type=jnp.float32)
        y2 = jnp.dot(p_ref[2], w, preferred_element_type=jnp.float32)
        y3 = jnp.dot(p_ref[3], w, preferred_element_type=jnp.float32)
        m = jnp.maximum(jnp.maximum(y0, y1), jnp.maximum(y2, y3))

    # Bias + ReLU once, AFTER the pool max (ReLU monotone, bias per-channel).
    o_ref[...] = jnp.maximum(m + b_ref[...], 0.0).astype(o_ref.dtype)


def fc_stack_kernel(x_ref, w1_ref, b1_ref, w2_ref, b2_ref, w3_ref, b3_ref,
                    w4_ref, b4_ref, o_ref):
    """Fused fc1..fc4: weights stay VMEM-resident, activations never hit HBM."""

    def layer(h, w_ref, b_ref, relu):
        y = jnp.dot(h.astype(jnp.bfloat16), w_ref[...],
                    preferred_element_type=jnp.float32) + b_ref[...]
        return jnp.maximum(y, 0.0) if relu else y

    h = layer(x_ref[...], w1_ref, b1_ref, True)
    h = layer(h, w2_ref, b2_ref, True)
    h = layer(h, w3_ref, b3_ref, True)
    o_ref[...] = layer(h, w4_ref, b4_ref, False)


# ----------------------------------------------------------------------------
# Wrappers (im2col glue + pallas_call plumbing)
# ----------------------------------------------------------------------------
def conv_relu_pool(x_nhwc, w_kc, b_1c):
    """Conv2d(k=3, stride=1, VALID) + ReLU + MaxPool2d(2) on an NHWC input."""
    n, h, w, cin = x_nhwc.shape
    cout = w_kc.shape[1]
    oh, ow = h - 2, w - 2
    ph, pw = oh // 2, ow // 2          # floor pooling (PyTorch default)
    k = 9 * cin

    # Pooled im2col patches built directly via strided slices (single fused
    # XLA copy; no intermediate full-resolution patch tensor):
    # pooled[dh*2+dw, (n,ph,pw), (kh,kw,ci)] = x[n, 2*ph+dh+kh, 2*pw+dw+kw, ci]
    groups = []
    for dh in range(2):
        for dw in range(2):
            feats = [x_nhwc[:, dh + kh:dh + kh + 2 * ph:2,
                            dw + kw:dw + kw + 2 * pw:2, :]
                     for kh in range(3) for kw in range(3)]
            groups.append(jnp.stack(feats, axis=-2))      # (N, PH, PW, 9, Cin)
    m = n * ph * pw
    pooled = jnp.stack(groups, axis=0).reshape(4, m, k)   # bf16

    tm = _CONV_ROW_TILE if m >= _CONV_ROW_TILE else m
    out = pl.pallas_call(
        conv_relu_pool_kernel,
        out_shape=jax.ShapeDtypeStruct((m, cout), jnp.bfloat16),
        grid=(pl.cdiv(m, tm),),
        in_specs=[
            pl.BlockSpec((4, tm, k), lambda i: (0, i, 0)),
            pl.BlockSpec((k, cout), lambda i: (0, 0)),
            pl.BlockSpec((1, cout), lambda i: (0, 0)),
        ],
        # NOTE: Cout (6/12) is not lane-dense; padding it to 128 lanes would
        # multiply HBM writeback 10-20x while stores are <5% of this kernel's
        # tile traffic, so the masked-store cost is accepted here.
        out_specs=pl.BlockSpec((tm, cout), lambda i: (i, 0)),
        compiler_params=pltpu.CompilerParams(dimension_semantics=("parallel",)),
    )(pooled, w_kc, b_1c)
    return out.reshape(n, ph, pw, cout)


def fc_stack(x, p):
    """Fused fc1..fc4 (ReLU on the first three), gridded over batch rows."""
    n, d = x.shape
    nout = p["w4"].shape[1]
    tb = _FC_ROW_TILE if n >= _FC_ROW_TILE else n
    consts = (p["w1"], p["b1"], p["w2"], p["b2"],
              p["w3"], p["b3"], p["w4"], p["b4"])

    def const_map(i):
        return (0, 0)

    return pl.pallas_call(
        fc_stack_kernel,
        out_shape=jax.ShapeDtypeStruct((n, nout), jnp.float32),
        grid=(pl.cdiv(n, tb),),
        in_specs=[pl.BlockSpec((tb, d), lambda i: (i, 0))]
                 + [pl.BlockSpec(c.shape, const_map) for c in consts],
        out_specs=pl.BlockSpec((tb, nout), lambda i: (i, 0)),
        compiler_params=pltpu.CompilerParams(dimension_semantics=("parallel",)),
    )(x, *consts)


# ----------------------------------------------------------------------------
# Parameters: PyTorch-style init + one-time conversion to kernel layouts
# ----------------------------------------------------------------------------
def init_params(key):
    def uniform(k, shape, fan_in):
        bound = 1.0 / jnp.sqrt(jnp.float32(fan_in))
        return jax.random.uniform(k, shape, jnp.float32, -bound, bound)

    ks = jax.random.split(key, 12)
    return {
        "conv1_w": uniform(ks[0], (6, 1, 3, 3), 1 * 9),
        "conv1_b": uniform(ks[1], (6,), 1 * 9),
        "conv2_w": uniform(ks[2], (12, 6, 3, 3), 6 * 9),
        "conv2_b": uniform(ks[3], (12,), 6 * 9),
        "fc1_w": uniform(ks[4], (140, 300), 300),
        "fc1_b": uniform(ks[5], (140,), 300),
        "fc2_w": uniform(ks[6], (80, 140), 140),
        "fc2_b": uniform(ks[7], (80,), 140),
        "fc3_w": uniform(ks[8], (40, 80), 80),
        "fc3_b": uniform(ks[9], (40,), 80),
        "fc4_w": uniform(ks[10], (10, 40), 40),
        "fc4_b": uniform(ks[11], (10,), 40),
    }


def prepare_params(params):
    """One-time (outside jit) conversion of PyTorch-layout params into
    kernel-ready layouts: bf16 matmul weights, (1, C) f32 biases, and fc1's
    input columns permuted from CHW-flatten to HWC-flatten order."""

    def conv_prep(w_oihw, b):
        cout, cin = w_oihw.shape[0], w_oihw.shape[1]
        # (Cout, Cin, kh, kw) -> (kh, kw, Cin, Cout) -> (K, Cout); matches the
        # (kh, kw, ci) ordering of the im2col patch features.
        wk = jnp.transpose(w_oihw, (2, 3, 1, 0)).reshape(9 * cin, cout)
        return wk.astype(jnp.bfloat16), b.reshape(1, cout).astype(jnp.float32)

    def fc_prep(w, b):
        return (jnp.transpose(w).astype(jnp.bfloat16),
                b.reshape(1, -1).astype(jnp.float32))

    c1w, c1b = conv_prep(params["conv1_w"], params["conv1_b"])
    c2w, c2b = conv_prep(params["conv2_w"], params["conv2_b"])

    # fc1 column permutation: PyTorch flattens (C, H, W); the NHWC pipeline
    # flattens (H, W, C).  Permuting the weight rows once makes the results
    # bit-identical while removing the runtime transpose.
    idx = jnp.arange(12 * 5 * 5)
    hp, rem = idx // (5 * 12), idx % (5 * 12)
    wp, c = rem // 12, rem % 12
    perm = c * 25 + hp * 5 + wp            # HWC index -> CHW index
    w1, b1 = fc_prep(params["fc1_w"], params["fc1_b"])
    w1 = w1[perm]
    w2, b2 = fc_prep(params["fc2_w"], params["fc2_b"])
    w3, b3 = fc_prep(params["fc3_w"], params["fc3_b"])
    w4, b4 = fc_prep(params["fc4_w"], params["fc4_b"])

    return {"c1_w": c1w, "c1_b": c1b, "c2_w": c2w, "c2_b": c2b,
            "w1": w1, "b1": b1, "w2": w2, "b2": b2,
            "w3": w3, "b3": b3, "w4": w4, "b4": b4}


# ----------------------------------------------------------------------------
# Forward pass matching my_network.forward
# ----------------------------------------------------------------------------
@jax.jit
def my_network_forward(x_nchw, p):
    n = x_nchw.shape[0]
    x = jnp.transpose(x_nchw, (0, 2, 3, 1)).astype(jnp.bfloat16)  # NCHW -> NHWC
    x = conv_relu_pool(x, p["c1_w"], p["c1_b"])                   # (N, 13, 13, 6)
    x = conv_relu_pool(x, p["c2_w"], p["c2_b"])                   # (N, 5, 5, 12)
    x = x.reshape(n, -1)   # (N, 300) HWC flatten (fc1 weights pre-permuted)
    return fc_stack(x, p)  # (N, 10) f32


# ----------------------------------------------------------------------------
# Pure-XLA f32 reference (mirrors the PyTorch module) for a sanity check
# ----------------------------------------------------------------------------
def reference_forward(x_nchw, params):
    def conv_block(x, w, b):
        y = jax.lax.conv_general_dilated(
            x, w, window_strides=(1, 1), padding="VALID",
            dimension_numbers=("NCHW", "OIHW", "NCHW"))
        y = jnp.maximum(y + b[None, :, None, None], 0.0)
        return jax.lax.reduce_window(y, -jnp.inf, jax.lax.max,
                                     (1, 1, 2, 2), (1, 1, 2, 2), "VALID")

    x = x_nchw.astype(jnp.float32)
    x = conv_block(x, params["conv1_w"], params["conv1_b"])
    x = conv_block(x, params["conv2_w"], params["conv2_b"])
    x = x.reshape(x.shape[0], -1)   # CHW flatten, like torch .view
    for name, relu in (("fc1", True), ("fc2", True), ("fc3", True), ("fc4", False)):
        x = x @ params[name + "_w"].T + params[name + "_b"]
        if relu:
            x = jnp.maximum(x, 0.0)
    return x


if __name__ == "__main__":
    key = jax.random.PRNGKey(0)
    k_params, k_data = jax.random.split(key)
    params = init_params(k_params)          # PyTorch-layout f32 parameters
    prepped = prepare_params(params)        # kernel-ready layouts (one-time)

    # fc1 expects 12*5*5 features => 28x28 single-channel input (MNIST-like).
    x = jax.random.normal(k_data, (2, 1, 28, 28), jnp.float32)

    out = jax.block_until_ready(my_network_forward(x, prepped))
    assert out.shape == (2, 10), out.shape

    # Sanity check against the f32 XLA reference (loose tol: bf16 MXU inputs).
    ref = reference_forward(x, params)
    err = float(jnp.max(jnp.abs(out - ref)))
    tol = 0.1 * float(jnp.max(jnp.abs(ref))) + 5e-3
    assert err <= tol, (err, tol)

    print("KERNEL_OK")
</pallas_src>

<mosaic_0001>
module attributes {stable_mosaic.version = 11 : i64} {
  func.func @conv_relu_pool_kernel(%arg0: i32, %arg1: memref<4x338x9xbf16, #tpu.memory_space<vmem>>, %arg2: memref<9x6xbf16, #tpu.memory_space<vmem>>, %arg3: memref<1x6xf32, #tpu.memory_space<vmem>>, %arg4: memref<338x6xbf16, #tpu.memory_space<vmem>>) attributes {dimension_semantics = [#tpu.dimension_semantics<parallel>], iteration_bounds = array<i64: 1>, scalar_prefetch = 0 : i64, scratch_operands = 0 : i64, tpu.core_type = #tpu.core_type<tc>, window_params = [{transform_indices = @transform_0, window_bounds = array<i64: 4, 338, 9>}, {pipeline_mode = #tpu.pipeline_mode<synchronous>, transform_indices = @transform_1, window_bounds = array<i64: 9, 6>}, {pipeline_mode = #tpu.pipeline_mode<synchronous>, transform_indices = @transform_2, window_bounds = array<i64: 1, 6>}, {transform_indices = @transform_3, window_bounds = array<i64: 338, 6>}]} {
    %c0 = arith.constant 0 : index
    %c0_0 = arith.constant 0 : index
    %0 = vector.load %arg2[%c0, %c0_0] : memref<9x6xbf16, #tpu.memory_space<vmem>>, vector<9x6xbf16>
    %c0_1 = arith.constant 0 : index
    %c0_2 = arith.constant 0 : index
    %c0_3 = arith.constant 0 : index
    %1 = vector.load %arg1[%c0_1, %c0_2, %c0_3] : memref<4x338x9xbf16, #tpu.memory_space<vmem>>, vector<1x338x9xbf16>
    %2 = vector.shape_cast %1 : vector<1x338x9xbf16> to vector<338x9xbf16>
    %cst = arith.constant dense<0.000000e+00> : vector<338x6xf32>
    %3 = tpu.matmul %2, %0, %cst {dimension_numbers = #tpu.dot_dimension_numbers<[1], [0], [0], [1], [0, 0, 1, 1], [], []>} : vector<338x9xbf16>, vector<9x6xbf16>, vector<338x6xf32> -> vector<338x6xf32>
    %c1 = arith.constant 1 : index
    %c0_4 = arith.constant 0 : index
    %c0_5 = arith.constant 0 : index
    %4 = vector.load %arg1[%c1, %c0_4, %c0_5] : memref<4x338x9xbf16, #tpu.memory_space<vmem>>, vector<1x338x9xbf16>
    %5 = vector.shape_cast %4 : vector<1x338x9xbf16> to vector<338x9xbf16>
    %cst_6 = arith.constant dense<0.000000e+00> : vector<338x6xf32>
    %6 = tpu.matmul %5, %0, %cst_6 {dimension_numbers = #tpu.dot_dimension_numbers<[1], [0], [0], [1], [0, 0, 1, 1], [], []>} : vector<338x9xbf16>, vector<9x6xbf16>, vector<338x6xf32> -> vector<338x6xf32>
    %c2 = arith.constant 2 : index
    %c0_7 = arith.constant 0 : index
    %c0_8 = arith.constant 0 : index
    %7 = vector.load %arg1[%c2, %c0_7, %c0_8] : memref<4x338x9xbf16, #tpu.memory_space<vmem>>, vector<1x338x9xbf16>
    %8 = vector.shape_cast %7 : vector<1x338x9xbf16> to vector<338x9xbf16>
    %cst_9 = arith.constant dense<0.000000e+00> : vector<338x6xf32>
    %9 = tpu.matmul %8, %0, %cst_9 {dimension_numbers = #tpu.dot_dimension_numbers<[1], [0], [0], [1], [0, 0, 1, 1], [], []>} : vector<338x9xbf16>, vector<9x6xbf16>, vector<338x6xf32> -> vector<338x6xf32>
    %c3 = arith.constant 3 : index
    %c0_10 = arith.constant 0 : index
    %c0_11 = arith.constant 0 : index
    %10 = vector.load %arg1[%c3, %c0_10, %c0_11] : memref<4x338x9xbf16, #tpu.memory_space<vmem>>, vector<1x338x9xbf16>
    %11 = vector.shape_cast %10 : vector<1x338x9xbf16> to vector<338x9xbf16>
    %cst_12 = arith.constant dense<0.000000e+00> : vector<338x6xf32>
    %12 = tpu.matmul %11, %0, %cst_12 {dimension_numbers = #tpu.dot_dimension_numbers<[1], [0], [0], [1], [0, 0, 1, 1], [], []>} : vector<338x9xbf16>, vector<9x6xbf16>, vector<338x6xf32> -> vector<338x6xf32>
    %13 = arith.maximumf %3, %6 : vector<338x6xf32>
    %14 = arith.maximumf %9, %12 : vector<338x6xf32>
    %15 = arith.maximumf %13, %14 : vector<338x6xf32>
    %c0_13 = arith.constant 0 : index
    %c0_14 = arith.constant 0 : index
    %16 = vector.load %arg3[%c0_13, %c0_14] : memref<1x6xf32, #tpu.memory_space<vmem>>, vector<1x6xf32>
    %17 = vector.broadcast %16 : vector<1x6xf32> to vector<338x6xf32>
    %18 = arith.addf %15, %17 : vector<338x6xf32>
    %cst_15 = arith.constant 0.000000e+00 : f32
    %19 = vector.broadcast %cst_15 : f32 to vector<338x6xf32>
    %20 = arith.maximumf %18, %19 : vector<338x6xf32>
    %21 = arith.truncf %20 : vector<338x6xf32> to vector<338x6xbf16>
    %c0_16 = arith.constant 0 : index
    %c0_17 = arith.constant 0 : index
    %22 = vector.load %arg4[%c0_16, %c0_17] : memref<338x6xbf16, #tpu.memory_space<vmem>>, vector<338x6xbf16>
    tpu.vector_store %arg4[%c0_16, %c0_17], %21 {strides = array<i32>} : memref<338x6xbf16, #tpu.memory_space<vmem>>, vector<338x6xbf16>,
    return
  }
  func.func @transform_0(%arg0: i32) -> (i32, i32, i32) {
    %c0_i32 = arith.constant 0 : i32
    %c0_i32_0 = arith.constant 0 : i32
    %c0_i32_1 = arith.constant 0 : i32
    return %c0_i32, %arg0, %c0_i32_0 : i32, i32, i32
  }
  func.func @transform_1(%arg0: i32) -> (i32, i32) {
    %c0_i32 = arith.constant 0 : i32
    %c0_i32_0 = arith.constant 0 : i32
    %c0_i32_1 = arith.constant 0 : i32
    return %c0_i32, %c0_i32_0 : i32, i32
  }
  func.func @transform_2(%arg0: i32) -> (i32, i32) {
    %c0_i32 = arith.constant 0 : i32
    %c0_i32_0 = arith.constant 0 : i32
    %c0_i32_1 = arith.constant 0 : i32
    return %c0_i32, %c0_i32_0 : i32, i32
  }
  func.func @transform_3(%arg0: i32) -> (i32, i32) {
    %c0_i32 = arith.constant 0 : i32
    %c0_i32_0 = arith.constant 0 : i32
    return %arg0, %c0_i32 : i32, i32
  }
}

module attributes {stable_mosaic.version = 11 : i64} {
  func.func @conv_relu_pool_kernel(%arg0: i32, %arg1: memref<4x50x54xbf16, #tpu.memory_space<vmem>>, %arg2: memref<54x12xbf16, #tpu.memory_space<vmem>>, %arg3: memref<1x12xf32, #tpu.memory_space<vmem>>, %arg4: memref<50x12xbf16, #tpu.memory_space<vmem>>) attributes {dimension_semantics = [#tpu.dimension_semantics<parallel>], iteration_bounds = array<i64: 1>, scalar_prefetch = 0 : i64, scratch_operands = 0 : i64, tpu.core_type = #tpu.core_type<tc>, window_params = [{transform_indices = @transform_0, window_bounds = array<i64: 4, 50, 54>}, {pipeline_mode = #tpu.pipeline_mode<synchronous>, transform_indices = @transform_1, window_bounds = array<i64: 54, 12>}, {pipeline_mode = #tpu.pipeline_mode<synchronous>, transform_indices = @transform_2, window_bounds = array<i64: 1, 12>}, {transform_indices = @transform_3, window_bounds = array<i64: 50, 12>}]} {
    %c0 = arith.constant 0 : index
    %c0_0 = arith.constant 0 : index
    %0 = vector.load %arg2[%c0, %c0_0] : memref<54x12xbf16, #tpu.memory_space<vmem>>, vector<54x12xbf16>
    %c0_1 = arith.constant 0 : index
    %c0_2 = arith.constant 0 : index
    %c0_3 = arith.constant 0 : index
    %1 = vector.load %arg1[%c0_1, %c0_2, %c0_3] : memref<4x50x54xbf16, #tpu.memory_space<vmem>>, vector<1x50x54xbf16>
    %2 = vector.shape_cast %1 : vector<1x50x54xbf16> to vector<50x54xbf16>
    %cst = arith.constant dense<0.000000e+00> : vector<50x12xf32>
    %3 = tpu.matmul %2, %0, %cst {dimension_numbers = #tpu.dot_dimension_numbers<[1], [0], [0], [1], [0, 0, 1, 1], [], []>} : vector<50x54xbf16>, vector<54x12xbf16>, vector<50x12xf32> -> vector<50x12xf32>
    %c1 = arith.constant 1 : index
    %c0_4 = arith.constant 0 : index
    %c0_5 = arith.constant 0 : index
    %4 = vector.load %arg1[%c1, %c0_4, %c0_5] : memref<4x50x54xbf16, #tpu.memory_space<vmem>>, vector<1x50x54xbf16>
    %5 = vector.shape_cast %4 : vector<1x50x54xbf16> to vector<50x54xbf16>
    %cst_6 = arith.constant dense<0.000000e+00> : vector<50x12xf32>
    %6 = tpu.matmul %5, %0, %cst_6 {dimension_numbers = #tpu.dot_dimension_numbers<[1], [0], [0], [1], [0, 0, 1, 1], [], []>} : vector<50x54xbf16>, vector<54x12xbf16>, vector<50x12xf32> -> vector<50x12xf32>
    %c2 = arith.constant 2 : index
    %c0_7 = arith.constant 0 : index
    %c0_8 = arith.constant 0 : index
    %7 = vector.load %arg1[%c2, %c0_7, %c0_8] : memref<4x50x54xbf16, #tpu.memory_space<vmem>>, vector<1x50x54xbf16>
    %8 = vector.shape_cast %7 : vector<1x50x54xbf16> to vector<50x54xbf16>
    %cst_9 = arith.constant dense<0.000000e+00> : vector<50x12xf32>
    %9 = tpu.matmul %8, %0, %cst_9 {dimension_numbers = #tpu.dot_dimension_numbers<[1], [0], [0], [1], [0, 0, 1, 1], [], []>} : vector<50x54xbf16>, vector<54x12xbf16>, vector<50x12xf32> -> vector<50x12xf32>
    %c3 = arith.constant 3 : index
    %c0_10 = arith.constant 0 : index
    %c0_11 = arith.constant 0 : index
    %10 = vector.load %arg1[%c3, %c0_10, %c0_11] : memref<4x50x54xbf16, #tpu.memory_space<vmem>>, vector<1x50x54xbf16>
    %11 = vector.shape_cast %10 : vector<1x50x54xbf16> to vector<50x54xbf16>
    %cst_12 = arith.constant dense<0.000000e+00> : vector<50x12xf32>
    %12 = tpu.matmul %11, %0, %cst_12 {dimension_numbers = #tpu.dot_dimension_numbers<[1], [0], [0], [1], [0, 0, 1, 1], [], []>} : vector<50x54xbf16>, vector<54x12xbf16>, vector<50x12xf32> -> vector<50x12xf32>
    %13 = arith.maximumf %3, %6 : vector<50x12xf32>
    %14 = arith.maximumf %9, %12 : vector<50x12xf32>
    %15 = arith.maximumf %13, %14 : vector<50x12xf32>
    %c0_13 = arith.constant 0 : index
    %c0_14 = arith.constant 0 : index
    %16 = vector.load %arg3[%c0_13, %c0_14] : memref<1x12xf32, #tpu.memory_space<vmem>>, vector<1x12xf32>
    %17 = vector.broadcast %16 : vector<1x12xf32> to vector<50x12xf32>
    %18 = arith.addf %15, %17 : vector<50x12xf32>
    %cst_15 = arith.constant 0.000000e+00 : f32
    %19 = vector.broadcast %cst_15 : f32 to vector<50x12xf32>
    %20 = arith.maximumf %18, %19 : vector<50x12xf32>
    %21 = arith.truncf %20 : vector<50x12xf32> to vector<50x12xbf16>
    %c0_16 = arith.constant 0 : index
    %c0_17 = arith.constant 0 : index
    %22 = vector.load %arg4[%c0_16, %c0_17] : memref<50x12xbf16, #tpu.memory_space<vmem>>, vector<50x12xbf16>
    tpu.vector_store %arg4[%c0_16, %c0_17], %21 {strides = array<i32>} : memref<50x12xbf16, #tpu.memory_space<vmem>>, vector<50x12xbf16>,
    return
  }
  func.func @transform_0(%arg0: i32) -> (i32, i32, i32) {
    %c0_i32 = arith.constant 0 : i32
    %c0_i32_0 = arith.constant 0 : i32
    %c0_i32_1 = arith.constant 0 : i32
    return %c0_i32, %arg0, %c0_i32_0 : i32, i32, i32
  }
  func.func @transform_1(%arg0: i32) -> (i32, i32) {
    %c0_i32 = arith.constant 0 : i32
    %c0_i32_0 = arith.constant 0 : i32
    %c0_i32_1 = arith.constant 0 : i32
    return %c0_i32, %c0_i32_0 : i32, i32
  }
  func.func @transform_2(%arg0: i32) -> (i32, i32) {
    %c0_i32 = arith.constant 0 : i32
    %c0_i32_0 = arith.constant 0 : i32
    %c0_i32_1 = arith.constant 0 : i32
    return %c0_i32, %c0_i32_0 : i32, i32
  }
  func.func @transform_3(%arg0: i32) -> (i32, i32) {
    %c0_i32 = arith.constant 0 : i32
    %c0_i32_0 = arith.constant 0 : i32
    return %arg0, %c0_i32 : i32, i32
  }
}

module attributes {stable_mosaic.version = 11 : i64} {
  func.func @fc_stack_kernel(%arg0: i32, %arg1: memref<2x300xbf16, #tpu.memory_space<vmem>>, %arg2: memref<300x140xbf16, #tpu.memory_space<vmem>>, %arg3: memref<1x140xf32, #tpu.memory_space<vmem>>, %arg4: memref<140x80xbf16, #tpu.memory_space<vmem>>, %arg5: memref<1x80xf32, #tpu.memory_space<vmem>>, %arg6: memref<80x40xbf16, #tpu.memory_space<vmem>>, %arg7: memref<1x40xf32, #tpu.memory_space<vmem>>, %arg8: memref<40x10xbf16, #tpu.memory_space<vmem>>, %arg9: memref<1x10xf32, #tpu.memory_space<vmem>>, %arg10: memref<2x10xf32, #tpu.memory_space<vmem>>) attributes {dimension_semantics = [#tpu.dimension_semantics<parallel>], iteration_bounds = array<i64: 1>, scalar_prefetch = 0 : i64, scratch_operands = 0 : i64, tpu.core_type = #tpu.core_type<tc>, window_params = [{transform_indices = @transform_0, window_bounds = array<i64: 2, 300>}, {pipeline_mode = #tpu.pipeline_mode<synchronous>, transform_indices = @transform_1, window_bounds = array<i64: 300, 140>}, {pipeline_mode = #tpu.pipeline_mode<synchronous>, transform_indices = @transform_2, window_bounds = array<i64: 1, 140>}, {pipeline_mode = #tpu.pipeline_mode<synchronous>, transform_indices = @transform_3, window_bounds = array<i64: 140, 80>}, {pipeline_mode = #tpu.pipeline_mode<synchronous>, transform_indices = @transform_4, window_bounds = array<i64: 1, 80>}, {pipeline_mode = #tpu.pipeline_mode<synchronous>, transform_indices = @transform_5, window_bounds = array<i64: 80, 40>}, {pipeline_mode = #tpu.pipeline_mode<synchronous>, transform_indices = @transform_6, window_bounds = array<i64: 1, 40>}, {pipeline_mode = #tpu.pipeline_mode<synchronous>, transform_indices = @transform_7, window_bounds = array<i64: 40, 10>}, {pipeline_mode = #tpu.pipeline_mode<synchronous>, transform_indices = @transform_8, window_bounds = array<i64: 1, 10>}, {transform_indices = @transform_9, window_bounds = array<i64: 2, 10>}]} {
    %c0 = arith.constant 0 : index
    %c0_0 = arith.constant 0 : index
    %0 = vector.load %arg1[%c0, %c0_0] : memref<2x300xbf16, #tpu.memory_space<vmem>>, vector<2x300xbf16>
    %c0_1 = arith.constant 0 : index
    %c0_2 = arith.constant 0 : index
    %1 = vector.load %arg2[%c0_1, %c0_2] : memref<300x140xbf16, #tpu.memory_space<vmem>>, vector<300x140xbf16>
    %cst = arith.constant dense<0.000000e+00> : vector<2x140xf32>
    %2 = tpu.matmul %0, %1, %cst {dimension_numbers = #tpu.dot_dimension_numbers<[1], [0], [0], [1], [0, 0, 1, 1], [], []>} : vector<2x300xbf16>, vector<300x140xbf16>, vector<2x140xf32> -> vector<2x140xf32>
    %c0_3 = arith.constant 0 : index
    %c0_4 = arith.constant 0 : index
    %3 = vector.load %arg3[%c0_3, %c0_4] : memref<1x140xf32, #tpu.memory_space<vmem>>, vector<1x140xf32>
    %4 = vector.broadcast %3 : vector<1x140xf32> to vector<2x140xf32>
    %5 = arith.addf %2, %4 : vector<2x140xf32>
    %cst_5 = arith.constant 0.000000e+00 : f32
    %6 = vector.broadcast %cst_5 : f32 to vector<2x140xf32>
    %7 = arith.maximumf %5, %6 : vector<2x140xf32>
    %8 = arith.truncf %7 : vector<2x140xf32> to vector<2x140xbf16>
    %c0_6 = arith.constant 0 : index
    %c0_7 = arith.constant 0 : index
    %9 = vector.load %arg4[%c0_6, %c0_7] : memref<140x80xbf16, #tpu.memory_space<vmem>>, vector<140x80xbf16>
    %cst_8 = arith.constant dense<0.000000e+00> : vector<2x80xf32>
    %10 = tpu.matmul %8, %9, %cst_8 {dimension_numbers = #tpu.dot_dimension_numbers<[1], [0], [0], [1], [0, 0, 1, 1], [], []>} : vector<2x140xbf16>, vector<140x80xbf16>, vector<2x80xf32> -> vector<2x80xf32>
    %c0_9 = arith.constant 0 : index
    %c0_10 = arith.constant 0 : index
    %11 = vector.load %arg5[%c0_9, %c0_10] : memref<1x80xf32, #tpu.memory_space<vmem>>, vector<1x80xf32>
    %12 = vector.broadcast %11 : vector<1x80xf32> to vector<2x80xf32>
    %13 = arith.addf %10, %12 : vector<2x80xf32>
    %cst_11 = arith.constant 0.000000e+00 : f32
    %14 = vector.broadcast %cst_11 : f32 to vector<2x80xf32>
    %15 = arith.maximumf %13, %14 : vector<2x80xf32>
    %16 = arith.truncf %15 : vector<2x80xf32> to vector<2x80xbf16>
    %c0_12 = arith.constant 0 : index
    %c0_13 = arith.constant 0 : index
    %17 = vector.load %arg6[%c0_12, %c0_13] : memref<80x40xbf16, #tpu.memory_space<vmem>>, vector<80x40xbf16>
    %cst_14 = arith.constant dense<0.000000e+00> : vector<2x40xf32>
    %18 = tpu.matmul %16, %17, %cst_14 {dimension_numbers = #tpu.dot_dimension_numbers<[1], [0], [0], [1], [0, 0, 1, 1], [], []>} : vector<2x80xbf16>, vector<80x40xbf16>, vector<2x40xf32> -> vector<2x40xf32>
    %c0_15 = arith.constant 0 : index
    %c0_16 = arith.constant 0 : index
    %19 = vector.load %arg7[%c0_15, %c0_16] : memref<1x40xf32, #tpu.memory_space<vmem>>, vector<1x40xf32>
    %20 = vector.broadcast %19 : vector<1x40xf32> to vector<2x40xf32>
    %21 = arith.addf %18, %20 : vector<2x40xf32>
    %cst_17 = arith.constant 0.000000e+00 : f32
    %22 = vector.broadcast %cst_17 : f32 to vector<2x40xf32>
    %23 = arith.maximumf %21, %22 : vector<2x40xf32>
    %24 = arith.truncf %23 : vector<2x40xf32> to vector<2x40xbf16>
    %c0_18 = arith.constant 0 : index
    %c0_19 = arith.constant 0 : index
    %25 = vector.load %arg8[%c0_18, %c0_19] : memref<40x10xbf16, #tpu.memory_space<vmem>>, vector<40x10xbf16>
    %cst_20 = arith.constant dense<0.000000e+00> : vector<2x10xf32>
    %26 = tpu.matmul %24, %25, %cst_20 {dimension_numbers = #tpu.dot_dimension_numbers<[1], [0], [0], [1], [0, 0, 1, 1], [], []>} : vector<2x40xbf16>, vector<40x10xbf16>, vector<2x10xf32> -> vector<2x10xf32>
    %c0_21 = arith.constant 0 : index
    %c0_22 = arith.constant 0 : index
    %27 = vector.load %arg9[%c0_21, %c0_22] : memref<1x10xf32, #tpu.memory_space<vmem>>, vector<1x10xf32>
    %28 = vector.broadcast %27 : vector<1x10xf32> to vector<2x10xf32>
    %29 = arith.addf %26, %28 : vector<2x10xf32>
    %c0_23 = arith.constant 0 : index
    %c0_24 = arith.constant 0 : index
    %30 = vector.load %arg10[%c0_23, %c0_24] : memref<2x10xf32, #tpu.memory_space<vmem>>, vector<2x10xf32>
    tpu.vector_store %arg10[%c0_23, %c0_24], %29 {strides = array<i32>} : memref<2x10xf32, #tpu.memory_space<vmem>>, vector<2x10xf32>,
    return
  }
  func.func @transform_0(%arg0: i32) -> (i32, i32) {
    %c0_i32 = arith.constant 0 : i32
    %c0_i32_0 = arith.constant 0 : i32
    return %arg0, %c0_i32 : i32, i32
  }
  func.func @transform_1(%arg0: i32) -> (i32, i32) {
    %c0_i32 = arith.constant 0 : i32
    %c0_i32_0 = arith.constant 0 : i32
    %c0_i32_1 = arith.constant 0 : i32
    return %c0_i32, %c0_i32_0 : i32, i32
  }
  func.func @transform_2(%arg0: i32) -> (i32, i32) {
    %c0_i32 = arith.constant 0 : i32
    %c0_i32_0 = arith.constant 0 : i32
    %c0_i32_1 = arith.constant 0 : i32
    return %c0_i32, %c0_i32_0 : i32, i32
  }
  func.func @transform_3(%arg0: i32) -> (i32, i32) {
    %c0_i32 = arith.constant 0 : i32
    %c0_i32_0 = arith.constant 0 : i32
    %c0_i32_1 = arith.constant 0 : i32
    return %c0_i32, %c0_i32_0 : i32, i32
  }
  func.func @transform_4(%arg0: i32) -> (i32, i32) {
    %c0_i32 = arith.constant 0 : i32
    %c0_i32_0 = arith.constant 0 : i32
    %c0_i32_1 = arith.constant 0 : i32
    return %c0_i32, %c0_i32_0 : i32, i32
  }
  func.func @transform_5(%arg0: i32) -> (i32, i32) {
    %c0_i32 = arith.constant 0 : i32
    %c0_i32_0 = arith.constant 0 : i32
    %c0_i32_1 = arith.constant 0 : i32
    return %c0_i32, %c0_i32_0 : i32, i32
  }
  func.func @transform_6(%arg0: i32) -> (i32, i32) {
    %c0_i32 = arith.constant 0 : i32
    %c0_i32_0 = arith.constant 0 : i32
    %c0_i32_1 = arith.constant 0 : i32
    return %c0_i32, %c0_i32_0 : i32, i32
  }
  func.func @transform_7(%arg0: i32) -> (i32, i32) {
    %c0_i32 = arith.constant 0 : i32
    %c0_i32_0 = arith.constant 0 : i32
    %c0_i32_1 = arith.constant 0 : i32
    return %c0_i32, %c0_i32_0 : i32, i32
  }
  func.func @transform_8(%arg0: i32) -> (i32, i32) {
    %c0_i32 = arith.constant 0 : i32
    %c0_i32_0 = arith.constant 0 : i32
    %c0_i32_1 = arith.constant 0 : i32
    return %c0_i32, %c0_i32_0 : i32, i32
  }
  func.func @transform_9(%arg0: i32) -> (i32, i32) {
    %c0_i32 = arith.constant 0 : i32
    %c0_i32_0 = arith.constant 0 : i32
    return %arg0, %c0_i32 : i32, i32
  }
}

</mosaic_0001>

<bundles_post_ra>
// kernel: my_network_forward.3
= control target key start
LH: loop header
LB: loop body
LE: loop exit
PB: predicated region body
PF: predicated region fallthrough
CT: control target
= control target key end

     0   :  { %vm240_vm0 = vcmask 1043456   ;;  %vm241_vm1 = vcmask 1044480   ;;  %vm173_vm2 = vcmask 72704   ;;  %v2936_v1 = vmov 65535   ;;  %s3918_s1 = inlined_call_operand.vmem [shape: bf16[9,6], index: 1, kind: input, shape index: {}]   ;;  %s3919_s0 = inlined_call_operand.vmem [shape: bf16[4,338,9], index: 0, kind: input, shape index: {}]   ;;  %s3920_s2 = inlined_call_operand.vmem [shape: f32[1,6], index: 2, kind: input, shape index: {}]   ;;  %s3921_s3 = inlined_call_operand.vmem [shape: bf16[338,6], index: 3, kind: output, shape index: {}]  }
   0x1   :  { %v2847_v0 = vld [vmem:[%s3918_s1] sm:$0x1f]   ;;  %v242_v2 = vsel %vm240_vm0, 4294967295, %v2936_v1  ;;  %v2849_v5 = vld [vmem:[%s3919_s0 + $0xac] sm:$0xff]   ;;  %v2851_v8 = vld [vmem:[%s3919_s0 + $0xb4] sm:$0xff]   ;;  %vm2128_vm3 = vcmask 44032  }
   0x2   :  { %v2848_v3 = vld [vmem:[%s3919_s0] sm:$0xff]   ;;  %v243_v4 = vsel %vm241_vm1, %v242_v2, 0  ;;  %2710 = vmatprep.mubr.msk.bf16.mxu1 %vm173_vm2, %v2849_v5  ;;  %v2850_v7 = vld [vmem:[%s3919_s0 + $0x8] sm:$0xff]   ;;  %v2852_v9 = vld [vmem:[%s3919_s0 + $0x10] sm:$0xff]   ;;  %vm2171_vm4 = vcmask 40960  }
   0x3   :  { %v245_v6 = vand.u32 %v2847_v0, %v243_v4  ;;  %2664 = vmatprep.mubr.msk.bf16.mxu0 %vm173_vm2, %v2848_v3  ;;  %v2853_v10 = vld [vmem:[%s3919_s0 + $0xbc] sm:$0xff]   ;;  %v2855_v12 = vld [vmem:[%s3919_s0 + $0xc4] sm:$0xff]   ;;  %v2857_v14 = vld [vmem:[%s3919_s0 + $0xcc] sm:$0xff]  }
   0x4   :  { %v2854_v11 = vld [vmem:[%s3919_s0 + $0x18] sm:$0xff]   ;;  %v2856_v13 = vld [vmem:[%s3919_s0 + $0x20] sm:$0xff]   ;;  %v2858_v15 = vld [vmem:[%s3919_s0 + $0x28] sm:$0xff]  }
   0x5   :  { %2662 = vmatprep.subr.bf16.mxu0 %v245_v6  ;;  %2708 = vmatprep.subr.bf16.mxu1 %v245_v6  ;;  %v2859_v16 = vld [vmem:[%s3919_s0 + $0xd4] sm:$0xff]   ;;  %v2861_v18 = vld [vmem:[%s3919_s0 + $0xdc] sm:$0xff]   ;;  %v2863_v20 = vld [vmem:[%s3919_s0 + $0xe4] sm:$0xff]  }
   0x6   :  { %2663 = vmatpush3.bf16.msra.mxu0 %v245_v6  ;;  %2709 = vmatpush3.bf16.msra.mxu1 %v245_v6  ;;  %v2860_v17 = vld [vmem:[%s3919_s0 + $0x30] sm:$0xff]   ;;  %v2862_v19 = vld [vmem:[%s3919_s0 + $0x38] sm:$0xff]   ;;  %v2864_v21 = vld [vmem:[%s3919_s0 + $0x40] sm:$0xff]  }
   0x7   :  { %2754 = vmatprep.subr.bf16.mxu0 %v245_v6  ;;  %2800 = vmatprep.subr.bf16.mxu1 %v245_v6  ;;  %v2865_v22 = vld [vmem:[%s3919_s0 + $0xec] sm:$0xff]   ;;  %v2867_v24 = vld [vmem:[%s3919_s0 + $0xf4] sm:$0xff]   ;;  %v2869_v26 = vld [vmem:[%s3919_s0 + $0xfc] sm:$0xff]  }
   0x8   :  { %v2866_v23 = vld [vmem:[%s3919_s0 + $0x48] sm:$0xff]   ;;  %v2868_v25 = vld [vmem:[%s3919_s0 + $0x50] sm:$0xff]   ;;  %v2870_v27 = vld [vmem:[%s3919_s0 + $0x58] sm:$0xff]  }
   0x9   :  { %2665 = vmatmul.mubr.msk.bf16.vlgmr.msra.gmra.mxu0 %vm173_vm2, %v2850_v7  ;;  %2711 = vmatmul.mubr.msk.bf16.vlgmr.msra.gmra.mxu1 %vm173_vm2, %v2851_v8  ;;  %v2871_v28 = vld [vmem:[%s3919_s0 + $0x104] sm:$0xff]   ;;  %v2873_v30 = vld [vmem:[%s3919_s0 + $0x10c] sm:$0xff]   ;;  %v2875_v32 = vld [vmem:[%s3919_s0 + $0x114] sm:$0xff]  }
   0xa   :  { %2755 = vmatpush3.bf16.msra.mxu0 %v245_v6  ;;  %2801 = vmatpush3.bf16.msra.mxu1 %v245_v6  ;;  %v2872_v29 = vld [vmem:[%s3919_s0 + $0x60] sm:$0xff]   ;;  %v2874_v31 = vld [vmem:[%s3919_s0 + $0x68] sm:$0xff]   ;;  %v2876_v33 = vld [vmem:[%s3919_s0 + $0x70] sm:$0xff]  }
   0xb   :  { %2668 = vmatprep.mubr.msk.bf16.mxu0 %vm173_vm2, %v2852_v9  ;;  %2714 = vmatprep.mubr.msk.bf16.mxu1 %vm173_vm2, %v2853_v10  ;;  %v2877_v34 = vld [vmem:[%s3919_s0 + $0x11c] sm:$0xff]   ;;  %v2879_v36 = vld [vmem:[%s3919_s0 + $0x124] sm:$0xff]   ;;  %v2881_v38 = vld [vmem:[%s3919_s0 + $0x12c] sm:$0xff]  }
   0xc   :  { %v2878_v35 = vld [vmem:[%s3919_s0 + $0x78] sm:$0xff]   ;;  %v2880_v37 = vld [vmem:[%s3919_s0 + $0x80] sm:$0xff]   ;;  %v2882_v39 = vld [vmem:[%s3919_s0 + $0x88] sm:$0xff]  }
   0xd   :  { %v2883_v40 = vld [vmem:[%s3919_s0 + $0x134] sm:$0xff]   ;;  %v2885_v42 = vld [vmem:[%s3919_s0 + $0x13c] sm:$0xff]   ;;  %v2887_v44 = vld [vmem:[%s3919_s0 + $0x144] sm:$0xff]  }
   0xe   :  { %v2884_v41 = vld [vmem:[%s3919_s0 + $0x90] sm:$0xff]   ;;  %v2886_v43 = vld [vmem:[%s3919_s0 + $0x98] sm:$0xff]   ;;  %v2888_v45 = vld [vmem:[%s3919_s0 + $0xa0] sm:$0xff]  }
   0xf   :  { %v2889_v46 = vld [vmem:[%s3919_s0 + $0x14c] sm:$0xff]   ;;  %v2890_v47 = vld [vmem:[%s3919_s0 + $0xa8] ss:$0 sps:$4 sm:$0x11]   ;;  %v2892_v49 = vld [vmem:[%s3919_s0 + $0x158] sm:$0xff]  }
  0x10   :  { %v2891_v48 = vld [vmem:[%s3919_s0 + $0x154] ss:$0 sps:$4 sm:$0x11]   ;;  %v2893_v50 = vld [vmem:[%s3919_s0 + $0x204] sm:$0xff]   ;;  %v2895_v52 = vld [vmem:[%s3919_s0 + $0x20c] sm:$0xff]  }
  0x11   :  { %2669 = vmatmul.mubr.msk.bf16.gmra.mxu0 %vm173_vm2, %v2854_v11  ;;  %2715 = vmatmul.mubr.msk.bf16.gmra.mxu1 %vm173_vm2, %v2855_v12  ;;  %v2894_v51 = vld [vmem:[%s3919_s0 + $0x160] sm:$0xff]   ;;  %v2896_v53 = vld [vmem:[%s3919_s0 + $0x168] sm:$0xff]   ;;  %v2897_v54 = vld [vmem:[%s3919_s0 + $0x214] sm:$0xff]  }
  0x12   :  { %2672 = vmatprep.mubr.msk.bf16.mxu0 %vm173_vm2, %v2856_v13  ;;  %2718 = vmatprep.mubr.msk.bf16.mxu1 %vm173_vm2, %v2857_v14  ;;  %v2898_v55 = vld [vmem:[%s3919_s0 + $0x170] sm:$0xff]   ;;  %v2899_v56 = vld [vmem:[%s3919_s0 + $0x21c] sm:$0xff]   ;;  %v2901_v58 = vld [vmem:[%s3919_s0 + $0x224] sm:$0xff]  }
  0x13   :  { %v2900_v57 = vld [vmem:[%s3919_s0 + $0x178] sm:$0xff]   ;;  %v2902_v59 = vld [vmem:[%s3919_s0 + $0x180] sm:$0xff]   ;;  %v2903_v60 = vld [vmem:[%s3919_s0 + $0x22c] sm:$0xff]  }
  0x14   :  { %v2904_v61 = vld [vmem:[%s3919_s0 + $0x188] sm:$0xff]   ;;  %v2905_v62 = vld [vmem:[%s3919_s0 + $0x234] sm:$0xff]   ;;  %v2907_v0 = vld [vmem:[%s3919_s0 + $0x23c] sm:$0xff]  }
  0x15   :  { %v2906_v63 = vld [vmem:[%s3919_s0 + $0x190] sm:$0xff]   ;;  %v2908_v1 = vld [vmem:[%s3919_s0 + $0x198] sm:$0xff]   ;;  %v2909_v2 = vld [vmem:[%s3919_s0 + $0x244] sm:$0xff]  }
  0x16   :  { %v2910_v3 = vld [vmem:[%s3919_s0 + $0x1a0] sm:$0xff]   ;;  %v2911_v4 = vld [vmem:[%s3919_s0 + $0x24c] sm:$0xff]   ;;  %v2913_v6 = vld [vmem:[%s3919_s0 + $0x254] sm:$0xff]  }
  0x17   :  { %v2912_v5 = vld [vmem:[%s3919_s0 + $0x1a8] sm:$0xff]   ;;  %v2914_v7 = vld [vmem:[%s3919_s0 + $0x1b0] sm:$0xff]   ;;  %v2915_v8 = vld [vmem:[%s3919_s0 + $0x25c] sm:$0xff]  }
  0x18   :  { %v2916_v9 = vld [vmem:[%s3919_s0 + $0x1b8] sm:$0xff]   ;;  %v2917_v10 = vld [vmem:[%s3919_s0 + $0x264] sm:$0xff]   ;;  %v2919_v12 = vld [vmem:[%s3919_s0 + $0x26c] sm:$0xff]  }
  0x19   :  { %2673 = vmatmul.mubr.msk.bf16.gmra.mxu0 %vm173_vm2, %v2858_v15  ;;  %2719 = vmatmul.mubr.msk.bf16.gmra.mxu1 %vm173_vm2, %v2859_v16  ;;  %v2918_v11 = vld [vmem:[%s3919_s0 + $0x1c0] sm:$0xff]   ;;  %v2920_v13 = vld [vmem:[%s3919_s0 + $0x1c8] sm:$0xff]   ;;  %v2921_v14 = vld [vmem:[%s3919_s0 + $0x274] sm:$0xff]  }
  0x1a   :  { %2676 = vmatprep.mubr.msk.bf16.mxu0 %vm173_vm2, %v2860_v17  ;;  %2722 = vmatprep.mubr.msk.bf16.mxu1 %vm173_vm2, %v2861_v18  ;;  %v2922_v15 = vld [vmem:[%s3919_s0 + $0x1d0] sm:$0xff]   ;;  %v2923_v16 = vld [vmem:[%s3919_s0 + $0x27c] sm:$0xff]   ;;  %v2925_v18 = vld [vmem:[%s3919_s0 + $0x284] sm:$0xff]  }
  0x1b   :  { %v2924_v17 = vld [vmem:[%s3919_s0 + $0x1d8] sm:$0xff]  }
  0x21   :  { %2677 = vmatmul.mubr.msk.bf16.gmra.mxu0 %vm173_vm2, %v2862_v19  ;;  %2723 = vmatmul.mubr.msk.bf16.gmra.mxu1 %vm173_vm2, %v2863_v20  ;;  %v2926_v19 = vld [vmem:[%s3919_s0 + $0x1e0] sm:$0xff]   ;;  %v2927_v20 = vld [vmem:[%s3919_s0 + $0x28c] sm:$0xff]  }
  0x22   :  { %2680 = vmatprep.mubr.msk.bf16.mxu0 %vm173_vm2, %v2864_v21  ;;  %2726 = vmatprep.mubr.msk.bf16.mxu1 %vm173_vm2, %v2865_v22  ;;  %v2928_v21 = vld [vmem:[%s3919_s0 + $0x1e8] sm:$0xff]   ;;  %v2929_v22 = vld [vmem:[%s3919_s0 + $0x294] sm:$0xff]  }
  0x29   :  { %2681 = vmatmul.mubr.msk.bf16.gmra.mxu0 %vm173_vm2, %v2866_v23  ;;  %2727 = vmatmul.mubr.msk.bf16.gmra.mxu1 %vm173_vm2, %v2867_v24  ;;  %v2930_v23 = vld [vmem:[%s3919_s0 + $0x1f0] sm:$0xff]   ;;  %v2931_v24 = vld [vmem:[%s3919_s0 + $0x29c] sm:$0xff]  }
  0x2a   :  { %2684 = vmatprep.mubr.msk.bf16.mxu0 %vm173_vm2, %v2868_v25  ;;  %2730 = vmatprep.mubr.msk.bf16.mxu1 %vm173_vm2, %v2869_v26  ;;  %v2932_v25 = vld [vmem:[%s3919_s0 + $0x1f8] sm:$0xff]   ;;  %v2933_v26 = vld [vmem:[%s3919_s0 + $0x2a4] sm:$0xff]  }
  0x31   :  { %2685 = vmatmul.mubr.msk.bf16.gmra.mxu0 %vm173_vm2, %v2870_v27  ;;  %2731 = vmatmul.mubr.msk.bf16.gmra.mxu1 %vm173_vm2, %v2871_v28  ;;  %v2934_v27 = vld [vmem:[%s3919_s0 + $0x200] ss:$0 sps:$4 sm:$0x11]   ;;  %v2935_v28 = vld [vmem:[%s3919_s0 + $0x2ac] ss:$0 sps:$4 sm:$0x11]  }
  0x32   :  { %2688 = vmatprep.mubr.msk.bf16.mxu0 %vm173_vm2, %v2872_v29  ;;  %2734 = vmatprep.mubr.msk.bf16.mxu1 %vm173_vm2, %v2873_v30 }
  0x39   :  { %2689 = vmatmul.mubr.msk.bf16.gmra.mxu0 %vm173_vm2, %v2874_v31  ;;  %2735 = vmatmul.mubr.msk.bf16.gmra.mxu1 %vm173_vm2, %v2875_v32 }
  0x3a   :  { %2692 = vmatprep.mubr.msk.bf16.mxu0 %vm173_vm2, %v2876_v33  ;;  %2738 = vmatprep.mubr.msk.bf16.mxu1 %vm173_vm2, %v2877_v34 }
  0x41   :  { %2693 = vmatmul.mubr.msk.bf16.gmra.mxu0 %vm173_vm2, %v2878_v35  ;;  %2739 = vmatmul.mubr.msk.bf16.gmra.mxu1 %vm173_vm2, %v2879_v36 }
  0x42   :  { %2696 = vmatprep.mubr.msk.bf16.mxu0 %vm173_vm2, %v2880_v37  ;;  %2742 = vmatprep.mubr.msk.bf16.mxu1 %vm173_vm2, %v2881_v38 }
  0x49   :  { %2697 = vmatmul.mubr.msk.bf16.gmra.mxu0 %vm173_vm2, %v2882_v39  ;;  %2743 = vmatmul.mubr.msk.bf16.gmra.mxu1 %vm173_vm2, %v2883_v40 }
  0x4a   :  { %2700 = vmatprep.mubr.msk.bf16.mxu0 %vm173_vm2, %v2884_v41  ;;  %2746 = vmatprep.mubr.msk.bf16.mxu1 %vm173_vm2, %v2885_v42 }
  0x51   :  { %2701 = vmatmul.mubr.msk.bf16.gmra.mxu0 %vm173_vm2, %v2886_v43  ;;  %2747 = vmatmul.mubr.msk.bf16.gmra.mxu1 %vm173_vm2, %v2887_v44 }
  0x52   :  { %2704 = vmatprep.mubr.msk.bf16.mxu0 %vm173_vm2, %v2888_v45  ;;  %2750 = vmatprep.mubr.msk.bf16.mxu1 %vm173_vm2, %v2889_v46 }
  0x59   :  { %2705 = vmatmul.mubr.msk.bf16.gmra.mxu0 %vm173_vm2, %v2890_v47  ;;  %2751 = vmatmul.mubr.msk.bf16.gmra.mxu1 %vm173_vm2, %v2891_v48 }
  0x5a   :  { %2756 = vmatprep.mubr.msk.bf16.mxu0 %vm173_vm2, %v2892_v49  ;;  %2802 = vmatprep.mubr.msk.bf16.mxu1 %vm173_vm2, %v2893_v50 }
  0x61   :  { %2757 = vmatmul.mubr.msk.bf16.vlgmr.msra.gmra.mxu0 %vm173_vm2, %v2894_v51  ;;  %2803 = vmatmul.mubr.msk.bf16.vlgmr.msra.gmra.mxu1 %vm173_vm2, %v2895_v52 }
  0x62   :  { %2760 = vmatprep.mubr.msk.bf16.mxu0 %vm173_vm2, %v2896_v53  ;;  %2806 = vmatprep.mubr.msk.bf16.mxu1 %vm173_vm2, %v2897_v54 }
  0x69   :  { %2761 = vmatmul.mubr.msk.bf16.gmra.mxu0 %vm173_vm2, %v2898_v55  ;;  %2807 = vmatmul.mubr.msk.bf16.gmra.mxu1 %vm173_vm2, %v2899_v56 }
  0x6a   :  { %2764 = vmatprep.mubr.msk.bf16.mxu0 %vm173_vm2, %v2900_v57  ;;  %2810 = vmatprep.mubr.msk.bf16.mxu1 %vm173_vm2, %v2901_v58 }
  0x71   :  { %2765 = vmatmul.mubr.msk.bf16.gmra.mxu0 %vm173_vm2, %v2902_v59  ;;  %2811 = vmatmul.mubr.msk.bf16.gmra.mxu1 %vm173_vm2, %v2903_v60 }
  0x72   :  { %2768 = vmatprep.mubr.msk.bf16.mxu0 %vm173_vm2, %v2904_v61  ;;  %2814 = vmatprep.mubr.msk.bf16.mxu1 %vm173_vm2, %v2905_v62 }
  0x79   :  { %2769 = vmatmul.mubr.msk.bf16.gmra.mxu0 %vm173_vm2, %v2906_v63  ;;  %2815 = vmatmul.mubr.msk.bf16.gmra.mxu1 %vm173_vm2, %v2907_v0 }
  0x7a   :  { %2772 = vmatprep.mubr.msk.bf16.mxu0 %vm173_vm2, %v2908_v1  ;;  %2818 = vmatprep.mubr.msk.bf16.mxu1 %vm173_vm2, %v2909_v2 }
  0x81   :  { %2773 = vmatmul.mubr.msk.bf16.gmra.mxu0 %vm173_vm2, %v2910_v3  ;;  %2819 = vmatmul.mubr.msk.bf16.gmra.mxu1 %vm173_vm2, %v2911_v4 }
  0x82   :  { %2776 = vmatprep.mubr.msk.bf16.mxu0 %vm173_vm2, %v2912_v5  ;;  %2822 = vmatprep.mubr.msk.bf16.mxu1 %vm173_vm2, %v2913_v6 }
  0x89   :  { %2777 = vmatmul.mubr.msk.bf16.gmra.mxu0 %vm173_vm2, %v2914_v7  ;;  %2823 = vmatmul.mubr.msk.bf16.gmra.mxu1 %vm173_vm2, %v2915_v8 }
  0x8a   :  { %2780 = vmatprep.mubr.msk.bf16.mxu0 %vm173_vm2, %v2916_v9  ;;  %2826 = vmatprep.mubr.msk.bf16.mxu1 %vm173_vm2, %v2917_v10 }
  0x91   :  { %2781 = vmatmul.mubr.msk.bf16.gmra.mxu0 %vm173_vm2, %v2918_v11  ;;  %2827 = vmatmul.mubr.msk.bf16.gmra.mxu1 %vm173_vm2, %v2919_v12 }
  0x92   :  { %2784 = vmatprep.mubr.msk.bf16.mxu0 %vm173_vm2, %v2920_v13  ;;  %2830 = vmatprep.mubr.msk.bf16.mxu1 %vm173_vm2, %v2921_v14 }
  0x99   :  { %2785 = vmatmul.mubr.msk.bf16.gmra.mxu0 %vm173_vm2, %v2922_v15  ;;  %2831 = vmatmul.mubr.msk.bf16.gmra.mxu1 %vm173_vm2, %v2923_v16 }
  0x9a   :  { %2788 = vmatprep.mubr.msk.bf16.mxu0 %vm173_vm2, %v2924_v17  ;;  %2834 = vmatprep.mubr.msk.bf16.mxu1 %vm173_vm2, %v2925_v18 }
  0xa1   :  { %2789 = vmatmul.mubr.msk.bf16.gmra.mxu0 %vm173_vm2, %v2926_v19  ;;  %2835 = vmatmul.mubr.msk.bf16.gmra.mxu1 %vm173_vm2, %v2927_v20 }
  0xa2   :  { %2792 = vmatprep.mubr.msk.bf16.mxu0 %vm173_vm2, %v2928_v21  ;;  %2838 = vmatprep.mubr.msk.bf16.mxu1 %vm173_vm2, %v2929_v22 }
  0xa9   :  { %2793 = vmatmul.mubr.msk.bf16.gmra.mxu0 %vm173_vm2, %v2930_v23  ;;  %2839 = vmatmul.mubr.msk.bf16.gmra.mxu1 %vm173_vm2, %v2931_v24  ;;  %v3573_v24 = vld [vmem:[%s3920_s2] ss:$0 sm:$0xff] }
  0xaa   :  { %2796 = vmatprep.mubr.msk.bf16.mxu0 %vm173_vm2, %v2932_v25  ;;  %2842 = vmatprep.mubr.msk.bf16.mxu1 %vm173_vm2, %v2933_v26 }
  0xb1   :  { %2797 = vmatmul.mubr.msk.bf16.gmra.mxu0 %vm173_vm2, %v2934_v27  ;;  %2843 = vmatmul.mubr.msk.bf16.gmra.mxu1 %vm173_vm2, %v2935_v28 }
  0xc9   :  { %v3312_v29 = vpop.f32.mrf.mxu0  ;;  %v3314_v30 = vpop.f32.mrf.mxu1 }
  0xcb   :  { %v3318_v32 = vpop.f32.mrf.mxu0  ;;  %v3320_v33 = vpop.f32.mrf.mxu1 }
  0xcc   :  { %v4003_v21 = vmax.f32 %v3318_v32, %v3320_v33 }
  0xcd   :  { %v3324_v35 = vpop.f32.mrf.mxu0  ;;  %v3326_v36 = vpop.f32.mrf.mxu1 }
  0xcf   :  { %v3330_v38 = vpop.f32.mrf.mxu0  ;;  %v3332_v39 = vpop.f32.mrf.mxu1 }
  0xd0   :  { %v4005_v32 = vmax.f32 %v3330_v38, %v3332_v39 }
  0xd1   :  { %v3336_v41 = vpop.f32.mrf.mxu0  ;;  %v3338_v42 = vpop.f32.mrf.mxu1 }
  0xd3   :  { %v3342_v44 = vpop.f32.mrf.mxu0  ;;  %v3344_v45 = vpop.f32.mrf.mxu1 }
  0xd5   :  { %v3348_v47 = vpop.f32.mrf.mxu0  ;;  %v3350_v48 = vpop.f32.mrf.mxu1 }
  0xd7   :  { %v3354_v50 = vpop.f32.mrf.mxu0  ;;  %v3356_v51 = vpop.f32.mrf.mxu1 }
  0xd9   :  { %v3360_v53 = vpop.f32.mrf.mxu0  ;;  %v3362_v54 = vpop.f32.mrf.mxu1 }
  0xdb   :  { %v3366_v56 = vpop.f32.mrf.mxu0  ;;  %v3368_v57 = vpop.f32.mrf.mxu1 }
  0xdd   :  { %v3372_v59 = vpop.f32.mrf.mxu0  ;;  %v3374_v60 = vpop.f32.mrf.mxu1 }
  0xdf   :  { %v3378_v62 = vpop.f32.mrf.mxu0  ;;  %v3380_v63 = vpop.f32.mrf.mxu1 }
  0xe1   :  { %v3384_v1 = vpop.f32.mrf.mxu0  ;;  %v3386_v2 = vpop.f32.mrf.mxu1 }
  0xe3   :  { %v3390_v4 = vpop.f32.mrf.mxu0  ;;  %v3392_v5 = vpop.f32.mrf.mxu1 }
  0xe5   :  { %v3396_v7 = vpop.f32.mrf.mxu0  ;;  %v3398_v8 = vpop.f32.mrf.mxu1 }
  0xe7   :  { %v3402_v10 = vpop.f32.mrf.mxu0  ;;  %v3404_v11 = vpop.f32.mrf.mxu1 }
  0xe9   :  { %v3408_v13 = vpop.f32.mrf.mxu0  ;;  %v3410_v14 = vpop.f32.mrf.mxu1 }
  0xeb   :  { %v3414_v16 = vpop.f32.mrf.mxu0  ;;  %v3416_v17 = vpop.f32.mrf.mxu1 }
  0xed   :  { %v3420_v19 = vpop.f32.mrf.mxu0  ;;  %v3422_v20 = vpop.f32.mrf.mxu1 }
  0xef   :  { %v3426_v22 = vpop.f32.mrf.mxu0  ;;  %v3428_v23 = vpop.f32.mrf.mxu1 }
  0xf1   :  { %v3432_v25 = vpop.f32.mrf.mxu0  ;;  %v3434_v26 = vpop.f32.mrf.mxu1 }
  0xf3   :  { %v3438_v28 = vpop.f32.mrf.mxu0  ;;  %v3440_v18 = vpop.f32.mrf.mxu1 }
  0xf5   :  { %v3444_v15 = vpop.f32.mrf.mxu0  ;;  %v3446_v12 = vpop.f32.mrf.mxu1 }
  0xf7   :  { %v3450_v9 = vpop.f32.mrf.mxu0  ;;  %v3452_v6 = vpop.f32.mrf.mxu1 }
  0xf8   :  { %3962 = vst [vmem:[#allocation2_spill] sm:$0xff] %v3450_v9  ;;  %3963 = vst [vmem:[#allocation3_spill] sm:$0xff] %v3452_v6  ;;  %v4004_v9 = vmax.f32 %v3324_v35, %v3326_v36 }
  0xf9   :  { %v3456_v3 = vpop.f32.mrf.mxu0  ;;  %v3458_v0 = vpop.f32.mrf.mxu1 }
  0xfa   :  { %3964 = vst [vmem:[#allocation4_spill] sm:$0xff] %v3456_v3  ;;  %3965 = vst [vmem:[#allocation5_spill] sm:$0xff] %v3458_v0 }
  0xfb   :  { %v3462_v61 = vpop.f32.mrf.mxu0  ;;  %v3464_v58 = vpop.f32.mrf.mxu1 }
  0xfc   :  { %3966 = vst [vmem:[#allocation6_spill] sm:$0xff] %v3462_v61  ;;  %3967 = vst [vmem:[#allocation7_spill] sm:$0xff] %v3464_v58 }
  0xfd   :  { %v3468_v55 = vpop.f32.mrf.mxu0  ;;  %v3470_v52 = vpop.f32.mrf.mxu1 }
  0xfe   :  { %3968 = vst [vmem:[#allocation8_spill] sm:$0xff] %v3468_v55  ;;  %3969 = vst [vmem:[#allocation9_spill] sm:$0xff] %v3470_v52 }
  0xff   :  { %v3474_v49 = vpop.f32.mrf.mxu0  ;;  %v3476_v46 = vpop.f32.mrf.mxu1 }
 0x100   :  { %3970 = vst [vmem:[#allocation10_spill] sm:$0xff] %v3474_v49  ;;  %3971 = vst [vmem:[#allocation11_spill] sm:$0xff] %v3476_v46 }
 0x101   :  { %v3480_v43 = vpop.f32.mrf.mxu0  ;;  %v3482_v40 = vpop.f32.mrf.mxu1 }
 0x102   :  { %3972 = vst [vmem:[#allocation12_spill] sm:$0xff] %v3480_v43  ;;  %3973 = vst [vmem:[#allocation13_spill] sm:$0xff] %v3482_v40 }
 0x103   :  { %v3486_v37 = vpop.f32.mrf.mxu0  ;;  %v3488_v34 = vpop.f32.mrf.mxu1 }
 0x104   :  { %3974 = vst [vmem:[#allocation14_spill] sm:$0xff] %v3486_v37  ;;  %3975 = vst [vmem:[#allocation15_spill] sm:$0xff] %v3488_v34 }
 0x105   :  { %v3492_v31 = vpop.f32.mrf.mxu0  ;;  %v3494_v52 = vpop.f32.mrf.mxu1 }
 0x106   :  { %3976 = vst [vmem:[#allocation16_spill] sm:$0xff] %v3492_v31  ;;  %3977 = vst [vmem:[#allocation17_spill] sm:$0xff] %v3494_v52 }
 0x107   :  { %v3498_v46 = vpop.f32.mrf.mxu0  ;;  %v3500_v49 = vpop.f32.mrf.mxu1 }
 0x108   :  { %3978 = vst [vmem:[#allocation18_spill] sm:$0xff] %v3498_v46  ;;  %3979 = vst [vmem:[#allocation19_spill] sm:$0xff] %v3500_v49 }
 0x109   :  { %v3504_v40 = vpop.f32.mrf.mxu0  ;;  %v3506_v43 = vpop.f32.mrf.mxu1 }
 0x10a   :  { %3980 = vst [vmem:[#allocation20_spill] sm:$0xff] %v3504_v40  ;;  %3981 = vst [vmem:[#allocation21_spill] sm:$0xff] %v3506_v43 }
 0x10b   :  { %v3510_v34 = vpop.f32.mrf.mxu0  ;;  %v3512_v37 = vpop.f32.mrf.mxu1 }
 0x10c   :  { %3982 = vst [vmem:[#allocation22_spill] sm:$0xff] %v3510_v34  ;;  %3983 = vst [vmem:[#allocation23_spill] sm:$0xff] %v3512_v37 }
 0x10d   :  { %v3516_v52 = vpop.f32.mrf.mxu0  ;;  %v3518_v31 = vpop.f32.mrf.mxu1 }
 0x10e   :  { %3984 = vst [vmem:[#allocation24_spill] sm:$0xff] %v3516_v52  ;;  %3985 = vst [vmem:[#allocation25_spill] sm:$0xff] %v3518_v31 }
 0x10f   :  { %v3522_v49 = vpop.f32.mrf.mxu0  ;;  %v3524_v46 = vpop.f32.mrf.mxu1 }
 0x110   :  { %3986 = vst [vmem:[#allocation26_spill] sm:$0xff] %v3522_v49  ;;  %3987 = vst [vmem:[#allocation27_spill] sm:$0xff] %v3524_v46 }
 0x111   :  { %v3528_v43 = vpop.f32.mrf.mxu0  ;;  %v3530_v40 = vpop.f32.mrf.mxu1 }
 0x112   :  { %3988 = vst [vmem:[#allocation28_spill] sm:$0xff] %v3528_v43  ;;  %3989 = vst [vmem:[#allocation29_spill] sm:$0xff] %v3530_v40 }
 0x113   :  { %v3534_v37 = vpop.f32.mrf.mxu0  ;;  %v3536_v34 = vpop.f32.mrf.mxu1 }
 0x114   :  { %3990 = vst [vmem:[#allocation30_spill] sm:$0xff] %v3534_v37  ;;  %3991 = vst [vmem:[#allocation31_spill] sm:$0xff] %v3536_v34 }
 0x115   :  { %v3540_v31 = vpop.f32.mrf.mxu0  ;;  %v3542_v52 = vpop.f32.mrf.mxu1 }
 0x116   :  { %3992 = vst [vmem:[#allocation32_spill] sm:$0xff] %v3540_v31  ;;  %3993 = vst [vmem:[#allocation33_spill] sm:$0xff] %v3542_v52 }
 0x117   :  { %v3546_v46 = vpop.f32.mrf.mxu0  ;;  %v3548_v49 = vpop.f32.mrf.mxu1 }
 0x118   :  { %3994 = vst [vmem:[#allocation34_spill] sm:$0xff] %v3546_v46  ;;  %3995 = vst [vmem:[#allocation35_spill] sm:$0xff] %v3548_v49 }
 0x119   :  { %v3552_v40 = vpop.f32.mrf.mxu0  ;;  %v3554_v43 = vpop.f32.mrf.mxu1 }
 0x11a   :  { %3996 = vst [vmem:[#allocation36_spill] sm:$0xff] %v3552_v40  ;;  %3997 = vst [vmem:[#allocation37_spill] sm:$0xff] %v3554_v43 }
 0x11b   :  { %v3558_v34 = vpop.f32.mrf.mxu0  ;;  %v3560_v37 = vpop.f32.mrf.mxu1 }
 0x11c   :  { %3998 = vst [vmem:[#allocation38_spill] sm:$0xff] %v3558_v34  ;;  %3999 = vst [vmem:[#allocation39_spill] sm:$0xff] %v3560_v37 }
 0x11d   :  { %v2707_v52 = vpop.f32.mrf.mxu0  ;;  %v2753_v31 = vpop.f32.mrf.mxu1 }
 0x11e   :  { %v4002_v31 = vmax.f32 %v3312_v29, %v3314_v30 }
 0x11f   :  { %v3564_v55 = vpop.f32.mrf.mxu0  ;;  %v3566_v58 = vpop.f32.mrf.mxu1 }
 0x120   :  { %4000 = vst [vmem:[#allocation40_spill] sm:$0xff] %v3564_v55  ;;  %4001 = vst [vmem:[#allocation41_spill] sm:$0xff] %v3566_v58 }
 0x121   :  { %v2758_v49 = vpop.f32.mrf.mxu0  ;;  %v2804_v46 = vpop.f32.mrf.mxu1 }
 0x122   :  { %v1778_v61 = vmax.f32 %v2758_v49, %v2804_v46 }
 0x123   :  { %v1133_v43 = vpop.f32.mrf.mxu0  ;;  %v1559_v40 = vpop.f32.mrf.mxu1 }
 0x124   :  { %v1821_v52 = vmax.f32 %v4002_v31, %v1778_v61  ;;  %v1776_v27 = vmax.f32 %v1133_v43, %v1559_v40 }
 0x125   :  { %v2759_v37 = vpop.f32.mrf.mxu0  ;;  %v2805_v34 = vpop.f32.mrf.mxu1 }
 0x126   :  { %v1871_v0 = vadd.f32 %v3573_v24, %v1821_v52  ;;  %v1819_v46 = vmax.f32 %v4003_v21, %v1776_v27  ;;  %v1779_v49 = vmax.f32 %v2759_v37, %v2805_v34  ;;  %v4007_v27 = vmax.f32 %v3342_v44, %v3344_v45 }
 0x127   :  { %v1136_v58 = vpop.f32.mrf.mxu0  ;;  %v1562_v55 = vpop.f32.mrf.mxu1 }
 0x128   :  { %v1914_v3 = vmax.f32 %v1871_v0, 0.0  ;;  %v1869_v6 = vadd.f32 %v3573_v24, %v1819_v46  ;;  %v1822_v29 = vmax.f32 %v4004_v9, %v1779_v49  ;;  %v1777_v30 = vmax.f32 %v1136_v58, %v1562_v55 }
 0x129   :  { %v2762_v40 = vpop.f32.mrf.mxu0  ;;  %v2808_v43 = vpop.f32.mrf.mxu1 }
 0x12a   :  { %v2529_v61 = vpack.c.bf16 %v1914_v3, %v1914_v3  ;;  %v1912_v31 = vmax.f32 %v1869_v6, 0.0  ;;  %v1872_v52 = vadd.f32 %v3573_v24, %v1822_v29  ;;  %v1820_v33 = vmax.f32 %v4005_v32, %v1777_v30 }
 0x12b   :  { %v1782_v34 = vmax.f32 %v2762_v40, %v2808_v43  ;;  %v1149_v37 = vpop.f32.mrf.mxu0  ;;  %v1575_v0 = vpop.f32.mrf.mxu1  ;;  %v4006_v3 = vmax.f32 %v3336_v41, %v3338_v42  ;;  %v4008_v43 = vmax.f32 %v3348_v47, %v3350_v48 }
 0x12c   :  { %2131 = vst.msk [vmem:[%s3921_s3 + $0x8] sm:$0xf] %vm2128_vm3, %v2529_v61  ;;  %v2527_v35 = vpack.c.bf16 %v1912_v31, %v1912_v31  ;;  %v1915_v36 = vmax.f32 %v1872_v52, 0.0  ;;  %v1870_v55 = vadd.f32 %v3573_v24, %v1820_v33  ;;  %v1780_v58 = vmax.f32 %v1149_v37, %v1575_v0 }
 0x12d   :  { %v1825_v6 = vmax.f32 %v4006_v3, %v1782_v34  ;;  %v2763_v9 = vpop.f32.mrf.mxu0  ;;  %v2809_v38 = vpop.f32.mrf.mxu1  ;;  %v4009_v34 = vmax.f32 %v3354_v50, %v3356_v51  ;;  %v4010_v3 = vmax.f32 %v3360_v53, %v3362_v54  ;;  %v4011_v53 = vmax.f32 %v3366_v56, %v3368_v57 }
 0x12e   :  { %2129 = vst.msk [vmem:[%s3921_s3] sm:$0xf] %vm2128_vm3, %v2527_v35  ;;  %v2530_v39 = vpack.c.bf16 %v1915_v36, %v1915_v36  ;;  %v1913_v21 = vmax.f32 %v1870_v55, 0.0  ;;  %v1823_v46 = vmax.f32 %v4007_v27, %v1780_v58  ;;  %v1783_v49 = vmax.f32 %v2763_v9, %v2809_v38 }
 0x12f   :  { %v1875_v29 = vadd.f32 %v3573_v24, %v1825_v6  ;;  %v1152_v30 = vpop.f32.mrf.mxu0  ;;  %v1578_v40 = vpop.f32.mrf.mxu1 }
 0x130   :  { %2132 = vst.msk [vmem:[%s3921_s3 + $0xc] sm:$0xf] %vm2128_vm3, %v2530_v39  ;;  %v2528_v41 = vpack.c.bf16 %v1913_v21, %v1913_v21  ;;  %v1873_v42 = vadd.f32 %v3573_v24, %v1823_v46  ;;  %v1826_v61 = vmax.f32 %v4008_v43, %v1783_v49  ;;  %v1781_v31 = vmax.f32 %v1152_v30, %v1578_v40 }
 0x131   :  { %v1918_v44 = vmax.f32 %v1875_v29, 0.0  ;;  %v2766_v45 = vpop.f32.mrf.mxu0  ;;  %v2812_v52 = vpop.f32.mrf.mxu1  ;;  %v4012_v40 = vmax.f32 %v3372_v59, %v3374_v60 }
 0x132   :  { %2130 = vst.msk [vmem:[%s3921_s3 + $0x4] sm:$0xf] %vm2128_vm3, %v2528_v41  ;;  %v1916_v32 = vmax.f32 %v1873_v42, 0.0  ;;  %v1876_v33 = vadd.f32 %v3573_v24, %v1826_v61  ;;  %v1824_v37 = vmax.f32 %v4009_v34, %v1781_v31  ;;  %v1786_v0 = vmax.f32 %v2766_v45, %v2812_v52 }
 0x133   :  { %v2533_v35 = vpack.c.bf16 %v1918_v44, %v1918_v44  ;;  %v1165_v47 = vpop.f32.mrf.mxu0  ;;  %v1591_v48 = vpop.f32.mrf.mxu1  ;;  %v4013_v44 = vmax.f32 %v3378_v62, %v3380_v63 }
 0x134   :  { %v2531_v36 = vpack.c.bf16 %v1916_v32, %v1916_v32  ;;  %v1919_v55 = vmax.f32 %v1876_v33, 0.0  ;;  %v1874_v58 = vadd.f32 %v3573_v24, %v1824_v37  ;;  %v1829_v6 = vmax.f32 %v4010_v3, %v1786_v0 }
 0x135   :  { %2135 = vst.msk [vmem:[%s3921_s3 + $0x18] sm:$0xf] %vm2128_vm3, %v2533_v35  ;;  %v1784_v9 = vmax.f32 %v1165_v47, %v1591_v48  ;;  %v2767_v50 = vpop.f32.mrf.mxu0  ;;  %v2813_v51 = vpop.f32.mrf.mxu1  ;;  %v4014_v37 = vmax.f32 %v3384_v1, %v3386_v2 }
 0x136   :  { %2133 = vst.msk [vmem:[%s3921_s3 + $0x10] sm:$0xf] %vm2128_vm3, %v2531_v36  ;;  %v2534_v38 = vpack.c.bf16 %v1919_v55, %v1919_v55  ;;  %v1917_v39 = vmax.f32 %v1874_v58, 0.0  ;;  %v1879_v21 = vadd.f32 %v3573_v24, %v1829_v6  ;;  %v1787_v27 = vmax.f32 %v2767_v50, %v2813_v51 }
 0x137   :  { %v1827_v54 = vmax.f32 %v4011_v53, %v1784_v9  ;;  %v1168_v46 = vpop.f32.mrf.mxu0  ;;  %v1594_v49 = vpop.f32.mrf.mxu1  ;;  %v4015_v58 = vmax.f32 %v3390_v4, %v3392_v5  ;;  %v4016_v4 = vmax.f32 %v3396_v7, %v3398_v8 }
 0x138   :  { %2136 = vst.msk [vmem:[%s3921_s3 + $0x1c] sm:$0xf] %vm2128_vm3, %v2534_v38  ;;  %v2532_v29 = vpack.c.bf16 %v1917_v39, %v1917_v39  ;;  %v1922_v30 = vmax.f32 %v1879_v21, 0.0  ;;  %v1830_v41 = vmax.f32 %v4012_v40, %v1787_v27  ;;  %v1785_v42 = vmax.f32 %v1168_v46, %v1594_v49 }
 0x139   :  { %v1877_v43 = vadd.f32 %v3573_v24, %v1827_v54  ;;  %v2770_v61 = vpop.f32.mrf.mxu0  ;;  %v2816_v31 = vpop.f32.mrf.mxu1  ;;  %v4017_v54 = vmax.f32 %v3402_v10, %v3404_v11 }
 0x13a   :  { %2134 = vst.msk [vmem:[%s3921_s3 + $0x14] sm:$0xf] %vm2128_vm3, %v2532_v29  ;;  %v2537_v56 = vpack.c.bf16 %v1922_v30, %v1922_v30  ;;  %v1880_v57 = vadd.f32 %v3573_v24, %v1830_v41  ;;  %v1828_v45 = vmax.f32 %v4013_v44, %v1785_v42  ;;  %v1790_v52 = vmax.f32 %v2770_v61, %v2816_v31 }
 0x13b   :  { %v1920_v59 = vmax.f32 %v1877_v43, 0.0  ;;  %v1181_v60 = vpop.f32.mrf.mxu0  ;;  %v1607_v32 = vpop.f32.mrf.mxu1  ;;  %v4018_v41 = vmax.f32 %v3408_v13, %v3410_v14 }
 0x13c   :  { %2139 = vst.msk [vmem:[%s3921_s3 + $0x28] sm:$0xf] %vm2128_vm3, %v2537_v56  ;;  %v1923_v33 = vmax.f32 %v1880_v57, 0.0  ;;  %v1878_v34 = vadd.f32 %v3573_v24, %v1828_v45  ;;  %v1833_v0 = vmax.f32 %v4014_v37, %v1790_v52  ;;  %v1788_v35 = vmax.f32 %v1181_v60, %v1607_v32 }
 0x13d   :  { %v2535_v47 = vpack.c.bf16 %v1920_v59, %v1920_v59  ;;  %v2771_v62 = vpop.f32.mrf.mxu0  ;;  %v2817_v63 = vpop.f32.mrf.mxu1  ;;  %v4019_v57 = vmax.f32 %v3414_v16, %v3416_v17 }
 0x13e   :  { %v2538_v48 = vpack.c.bf16 %v1923_v33, %v1923_v33  ;;  %v1921_v36 = vmax.f32 %v1878_v34, 0.0  ;;  %v1883_v55 = vadd.f32 %v3573_v24, %v1833_v0  ;;  %v1831_v3 = vmax.f32 %v4015_v58, %v1788_v35 }
 0x13f   :  { %2137 = vst.msk [vmem:[%s3921_s3 + $0x20] sm:$0xf] %vm2128_vm3, %v2535_v47  ;;  %v1791_v6 = vmax.f32 %v2771_v62, %v2817_v63  ;;  %v1184_v1 = vpop.f32.mrf.mxu0  ;;  %v1610_v2 = vpop.f32.mrf.mxu1  ;;  %v4020_v33 = vmax.f32 %v3420_v19, %v3422_v20  ;;  %v4021_v19 = vmax.f32 %v3426_v22, %v3428_v23  ;;  %v4022_v58 = vmax.f32 %v3432_v25, %v3434_v26 }
 0x140   :  { %2140 = vst.msk [vmem:[%s3921_s3 + $0x2c] sm:$0xf] %vm2128_vm3, %v2538_v48  ;;  %v2536_v9 = vpack.c.bf16 %v1921_v36, %v1921_v36  ;;  %v1926_v50 = vmax.f32 %v1883_v55, 0.0  ;;  %v1881_v51 = vadd.f32 %v3573_v24, %v1831_v3  ;;  %v1789_v38 = vmax.f32 %v1184_v1, %v1610_v2 }
 0x141   :  { %v1834_v5 = vmax.f32 %v4016_v4, %v1791_v6  ;;  %v2774_v39 = vpop.f32.mrf.mxu0  ;;  %v2820_v21 = vpop.f32.mrf.mxu1 }
 0x142   :  { %2138 = vst.msk [vmem:[%s3921_s3 + $0x24] sm:$0xf] %vm2128_vm3, %v2536_v9  ;;  %v2541_v27 = vpack.c.bf16 %v1926_v50, %v1926_v50  ;;  %v1924_v53 = vmax.f32 %v1881_v51, 0.0  ;;  %v1832_v46 = vmax.f32 %v4017_v54, %v1789_v38  ;;  %v1794_v49 = vmax.f32 %v2774_v39, %v2820_v21 }
 0x143   :  { %v1884_v29 = vadd.f32 %v3573_v24, %v1834_v5  ;;  %v1197_v30 = vpop.f32.mrf.mxu0  ;;  %v1623_v40 = vpop.f32.mrf.mxu1  ;;  %v4023_v50 = vmax.f32 %v3438_v28, %v3440_v18  ;;  %v4024_v21 = vmax.f32 %v3444_v15, %v3446_v12 }
 0x144   :  { %2143 = vst.msk [vmem:[%s3921_s3 + $0x38] sm:$0xf] %vm2128_vm3, %v2541_v27  ;;  %v2539_v7 = vpack.c.bf16 %v1924_v53, %v1924_v53  ;;  %v1882_v8 = vadd.f32 %v3573_v24, %v1832_v46  ;;  %v1837_v42 = vmax.f32 %v4018_v41, %v1794_v49  ;;  %v1792_v43 = vmax.f32 %v1197_v30, %v1623_v40  ;;  %v4025_v30 = vld [vmem:[#allocation2_spill] sm:$0xff]  ;;  %v4026_v40 = vld [vmem:[#allocation3_spill] sm:$0xff] }
 0x145   :  { %v1927_v10 = vmax.f32 %v1884_v29, 0.0  ;;  %v2775_v11 = vpop.f32.mrf.mxu0  ;;  %v2821_v61 = vpop.f32.mrf.mxu1 }
 0x146   :  { %2141 = vst.msk [vmem:[%s3921_s3 + $0x30] sm:$0xf] %vm2128_vm3, %v2539_v7  ;;  %v1925_v31 = vmax.f32 %v1882_v8, 0.0  ;;  %v1887_v56 = vadd.f32 %v3573_v24, %v1837_v42  ;;  %v1835_v44 = vmax.f32 %v4019_v57, %v1792_v43  ;;  %v1795_v45 = vmax.f32 %v2775_v11, %v2821_v61  ;;  %v4028_v61 = vld [vmem:[#allocation4_spill] sm:$0xff] }
 0x147   :  { %v2542_v52 = vpack.c.bf16 %v1927_v10, %v1927_v10  ;;  %v1200_v13 = vpop.f32.mrf.mxu0  ;;  %v1626_v14 = vpop.f32.mrf.mxu1  ;;  %v4027_v7 = vmax.f32 %v4025_v30, %v4026_v40 }
 0x148   :  { %v2540_v59 = vpack.c.bf16 %v1925_v31, %v1925_v31  ;;  %v1930_v60 = vmax.f32 %v1887_v56, 0.0  ;;  %v1885_v32 = vadd.f32 %v3573_v24, %v1835_v44  ;;  %v1838_v34 = vmax.f32 %v4020_v33, %v1795_v45  ;;  %v4029_v31 = vld [vmem:[#allocation5_spill] sm:$0xff] }
 0x149   :  { %2144 = vst.msk [vmem:[%s3921_s3 + $0x3c] sm:$0xf] %vm2128_vm3, %v2542_v52  ;;  %v1793_v37 = vmax.f32 %v1200_v13, %v1626_v14  ;;  %v2778_v16 = vpop.f32.mrf.mxu0  ;;  %v2824_v17 = vpop.f32.mrf.mxu1  ;;  %v4030_v56 = vmax.f32 %v4028_v61, %v4029_v31  ;;  %v4031_v14 = vld [vmem:[#allocation6_spill] sm:$0xff] }
 0x14a   :  { %2142 = vst.msk [vmem:[%s3921_s3 + $0x34] sm:$0xf] %vm2128_vm3, %v2540_v59  ;;  %v2545_v0 = vpack.c.bf16 %v1930_v60, %v1930_v60  ;;  %v1928_v35 = vmax.f32 %v1885_v32, 0.0  ;;  %v1888_v47 = vadd.f32 %v3573_v24, %v1838_v34  ;;  %v1798_v62 = vmax.f32 %v2778_v16, %v2824_v17  ;;  %v4032_v59 = vld [vmem:[#allocation7_spill] sm:$0xff] }
 0x14b   :  { %v1836_v20 = vmax.f32 %v4021_v19, %v1793_v37  ;;  %v1213_v63 = vpop.f32.mrf.mxu0  ;;  %v1639_v48 = vpop.f32.mrf.mxu1  ;;  %v4033_v60 = vmax.f32 %v4031_v14, %v4032_v59 }
 0x14c   :  { %2147 = vst.msk [vmem:[%s3921_s3 + $0x48] sm:$0xf] %vm2128_vm3, %v2545_v0  ;;  %v2543_v36 = vpack.c.bf16 %v1928_v35, %v1928_v35  ;;  %v1931_v55 = vmax.f32 %v1888_v47, 0.0  ;;  %v1841_v3 = vmax.f32 %v4022_v58, %v1798_v62  ;;  %v1796_v6 = vmax.f32 %v1213_v63, %v1639_v48  ;;  %v4034_v35 = vld [vmem:[#allocation8_spill] sm:$0xff]  ;;  %v4035_v47 = vld [vmem:[#allocation9_spill] sm:$0xff] }
 0x14d   :  { %v1886_v1 = vadd.f32 %v3573_v24, %v1836_v20  ;;  %v2779_v2 = vpop.f32.mrf.mxu0  ;;  %v2825_v9 = vpop.f32.mrf.mxu1  ;;  %v4036_v62 = vmax.f32 %v4034_v35, %v4035_v47 }
 0x14e   :  { %2145 = vst.msk [vmem:[%s3921_s3 + $0x40] sm:$0xf] %vm2128_vm3, %v2543_v36  ;;  %v2546_v22 = vpack.c.bf16 %v1931_v55, %v1931_v55  ;;  %v1891_v23 = vadd.f32 %v3573_v24, %v1841_v3  ;;  %v1839_v51 = vmax.f32 %v4023_v50, %v1796_v6  ;;  %v1799_v38 = vmax.f32 %v2779_v2, %v2825_v9  ;;  %v4037_v3 = vld [vmem:[#allocation10_spill] sm:$0xff]  ;;  %v4038_v6 = vld [vmem:[#allocation11_spill] sm:$0xff] }
 0x14f   :  { %v1929_v25 = vmax.f32 %v1886_v1, 0.0  ;;  %v1216_v26 = vpop.f32.mrf.mxu0  ;;  %v1642_v4 = vpop.f32.mrf.mxu1  ;;  %v4039_v1 = vmax.f32 %v4037_v3, %v4038_v6 }
 0x150   :  { %2148 = vst.msk [vmem:[%s3921_s3 + $0x4c] sm:$0xf] %vm2128_vm3, %v2546_v22  ;;  %v1934_v5 = vmax.f32 %v1891_v23, 0.0  ;;  %v1889_v39 = vadd.f32 %v3573_v24, %v1839_v51  ;;  %v1842_v27 = vmax.f32 %v4024_v21, %v1799_v38  ;;  %v1797_v53 = vmax.f32 %v1216_v26, %v1642_v4  ;;  %v4040_v26 = vld [vmem:[#allocation12_spill] sm:$0xff]  ;;  %v4041_v4 = vld [vmem:[#allocation13_spill] sm:$0xff] }
 0x151   :  { %v2544_v54 = vpack.c.bf16 %v1929_v25, %v1929_v25  ;;  %v2782_v18 = vpop.f32.mrf.mxu0  ;;  %v2828_v28 = vpop.f32.mrf.mxu1 }
 0x152   :  { %v2549_v46 = vpack.c.bf16 %v1934_v5, %v1934_v5  ;;  %v1932_v49 = vmax.f32 %v1889_v39, 0.0  ;;  %v1892_v29 = vadd.f32 %v3573_v24, %v1842_v27  ;;  %v1840_v8 = vmax.f32 %v4027_v7, %v1797_v53 }
 0x153   :  { %2146 = vst.msk [vmem:[%s3921_s3 + $0x44] sm:$0xf] %vm2128_vm3, %v2544_v54  ;;  %v1802_v41 = vmax.f32 %v2782_v18, %v2828_v28  ;;  %v1229_v12 = vpop.f32.mrf.mxu0  ;;  %v1655_v15 = vpop.f32.mrf.mxu1  ;;  %v4042_v5 = vmax.f32 %v4040_v26, %v4041_v4 }
 0x154   :  { %2151 = vst.msk [vmem:[%s3921_s3 + $0x58] sm:$0xf] %vm2128_vm3, %v2549_v46  ;;  %v2547_v42 = vpack.c.bf16 %v1932_v49, %v1932_v49  ;;  %v1935_v43 = vmax.f32 %v1892_v29, 0.0  ;;  %v1890_v10 = vadd.f32 %v3573_v24, %v1840_v8  ;;  %v1800_v11 = vmax.f32 %v1229_v12, %v1655_v15  ;;  %v4043_v49 = vld [vmem:[#allocation14_spill] sm:$0xff]  ;;  %v4044_v29 = vld [vmem:[#allocation15_spill] sm:$0xff]  ;;  %v4046_v15 = vld [vmem:[#allocation16_spill] sm:$0xff] }
 0x155   :  { %v1845_v57 = vmax.f32 %v4030_v56, %v1802_v41  ;;  %v2783_v44 = vpop.f32.mrf.mxu0  ;;  %v2829_v45 = vpop.f32.mrf.mxu1  ;;  %v4045_v30 = vmax.f32 %v4043_v49, %v4044_v29 }
 0x156   :  { %2149 = vst.msk [vmem:[%s3921_s3 + $0x50] sm:$0xf] %vm2128_vm3, %v2547_v42  ;;  %v2550_v52 = vpack.c.bf16 %v1935_v43, %v1935_v43  ;;  %v1933_v13 = vmax.f32 %v1890_v10, 0.0  ;;  %v1843_v32 = vmax.f32 %v4033_v60, %v1800_v11  ;;  %v1803_v33 = vmax.f32 %v2783_v44, %v2829_v45  ;;  %v4047_v42 = vld [vmem:[#allocation17_spill] sm:$0xff]  ;;  %v4049_v45 = vld [vmem:[#allocation18_spill] sm:$0xff] }
 0x157   :  { %v1895_v34 = vadd.f32 %v3573_v24, %v1845_v57  ;;  %v1232_v37 = vpop.f32.mrf.mxu0  ;;  %v1658_v16 = vpop.f32.mrf.mxu1  ;;  %v4048_v43 = vmax.f32 %v4046_v15, %v4047_v42 }
 0x158   :  { %2152 = vst.msk [vmem:[%s3921_s3 + $0x5c] sm:$0xf] %vm2128_vm3, %v2550_v52  ;;  %v2548_v17 = vpack.c.bf16 %v1933_v13, %v1933_v13  ;;  %v1893_v0 = vadd.f32 %v3573_v24, %v1843_v32  ;;  %v1846_v19 = vmax.f32 %v4036_v62, %v1803_v33  ;;  %v1801_v20 = vmax.f32 %v1232_v37, %v1658_v16  ;;  %v4050_v52 = vld [vmem:[#allocation19_spill] sm:$0xff]  ;;  %v4052_v16 = vld [vmem:[#allocation20_spill] sm:$0xff] }
 0x159   :  { %v1938_v63 = vmax.f32 %v1895_v34, 0.0  ;;  %v2786_v48 = vpop.f32.mrf.mxu0  ;;  %v2832_v36 = vpop.f32.mrf.mxu1  ;;  %v4051_v13 = vmax.f32 %v4049_v45, %v4050_v52 }
 0x15a   :  { %2150 = vst.msk [vmem:[%s3921_s3 + $0x54] sm:$0xf] %vm2128_vm3, %v2548_v17  ;;  %v1936_v55 = vmax.f32 %v1893_v0, 0.0  ;;  %v1896_v58 = vadd.f32 %v3573_v24, %v1846_v19  ;;  %v1844_v2 = vmax.f32 %v4039_v1, %v1801_v20  ;;  %v1806_v9 = vmax.f32 %v2786_v48, %v2832_v36  ;;  %v4053_v17 = vld [vmem:[#allocation21_spill] sm:$0xff] }
 0x15b   :  { %v2553_v22 = vpack.c.bf16 %v1938_v63, %v1938_v63  ;;  %v1245_v23 = vpop.f32.mrf.mxu0  ;;  %v1671_v50 = vpop.f32.mrf.mxu1  ;;  %v4054_v0 = vmax.f32 %v4052_v16, %v4053_v17 }
 0x15c   :  { %v2551_v51 = vpack.c.bf16 %v1936_v55, %v1936_v55  ;;  %v1939_v38 = vmax.f32 %v1896_v58, 0.0  ;;  %v1894_v25 = vadd.f32 %v3573_v24, %v1844_v2  ;;  %v1849_v39 = vmax.f32 %v4042_v5, %v1806_v9  ;;  %v4055_v55 = vld [vmem:[#allocation22_spill] sm:$0xff]  ;;  %v4056_v58 = vld [vmem:[#allocation23_spill] sm:$0xff] }
 0x15d   :  { %2155 = vst.msk [vmem:[%s3921_s3 + $0x68] sm:$0xf] %vm2128_vm3, %v2553_v22  ;;  %v1804_v21 = vmax.f32 %v1245_v23, %v1671_v50  ;;  %v2787_v27 = vpop.f32.mrf.mxu0  ;;  %v2833_v53 = vpop.f32.mrf.mxu1  ;;  %v4057_v3 = vmax.f32 %v4055_v55, %v4056_v58 }
 0x15e   :  { %2153 = vst.msk [vmem:[%s3921_s3 + $0x60] sm:$0xf] %vm2128_vm3, %v2551_v51  ;;  %v2554_v54 = vpack.c.bf16 %v1939_v38, %v1939_v38  ;;  %v1937_v18 = vmax.f32 %v1894_v25, 0.0  ;;  %v1899_v28 = vadd.f32 %v3573_v24, %v1849_v39  ;;  %v1807_v46 = vmax.f32 %v2787_v27, %v2833_v53  ;;  %v4058_v38 = vld [vmem:[#allocation24_spill] sm:$0xff]  ;;  %v4059_v25 = vld [vmem:[#allocation25_spill] sm:$0xff]  ;;  %v4061_v53 = vld [vmem:[#allocation26_spill] sm:$0xff] }
 0x15f   :  { %v1847_v40 = vmax.f32 %v4045_v30, %v1804_v21  ;;  %v1248_v7 = vpop.f32.mrf.mxu0  ;;  %v1674_v8 = vpop.f32.mrf.mxu1  ;;  %v4060_v26 = vmax.f32 %v4058_v38, %v4059_v25 }
 0x160   :  { %2156 = vst.msk [vmem:[%s3921_s3 + $0x6c] sm:$0xf] %vm2128_vm3, %v2554_v54  ;;  %v2552_v41 = vpack.c.bf16 %v1937_v18, %v1937_v18  ;;  %v1942_v12 = vmax.f32 %v1899_v28, 0.0  ;;  %v1850_v10 = vmax.f32 %v4048_v43, %v1807_v46  ;;  %v1805_v11 = vmax.f32 %v1248_v7, %v1674_v8  ;;  %v4062_v54 = vld [vmem:[#allocation27_spill] sm:$0xff]  ;;  %v4064_v8 = vld [vmem:[#allocation28_spill] sm:$0xff] }
 0x161   :  { %v1897_v61 = vadd.f32 %v3573_v24, %v1847_v40  ;;  %v2790_v31 = vpop.f32.mrf.mxu0  ;;  %v2836_v56 = vpop.f32.mrf.mxu1  ;;  %v4063_v18 = vmax.f32 %v4061_v53, %v4062_v54 }
 0x162   :  { %2154 = vst.msk [vmem:[%s3921_s3 + $0x64] sm:$0xf] %vm2128_vm3, %v2552_v41  ;;  %v2557_v57 = vpack.c.bf16 %v1942_v12, %v1942_v12  ;;  %v1900_v44 = vadd.f32 %v3573_v24, %v1850_v10  ;;  %v1848_v14 = vmax.f32 %v4051_v13, %v1805_v11  ;;  %v1810_v59 = vmax.f32 %v2790_v31, %v2836_v56  ;;  %v4065_v41 = vld [vmem:[#allocation29_spill] sm:$0xff]  ;;  %v4067_v56 = vld [vmem:[#allocation30_spill] sm:$0xff] }
 0x163   :  { %v1940_v60 = vmax.f32 %v1897_v61, 0.0  ;;  %v1261_v32 = vpop.f32.mrf.mxu0  ;;  %v1687_v33 = vpop.f32.mrf.mxu1  ;;  %v4066_v12 = vmax.f32 %v4064_v8, %v4065_v41  ;;  %v4082_v8 = vld [vmem:[#allocation40_spill] sm:$0xff]  ;;  %v4083_v41 = vld [vmem:[#allocation41_spill] sm:$0xff] }
 0x164   :  { %2159 = vst.msk [vmem:[%s3921_s3 + $0x78] sm:$0xf] %vm2128_vm3, %v2557_v57  ;;  %v1943_v34 = vmax.f32 %v1900_v44, 0.0  ;;  %v1898_v37 = vadd.f32 %v3573_v24, %v1848_v14  ;;  %v1853_v35 = vmax.f32 %v4054_v0, %v1810_v59  ;;  %v1808_v47 = vmax.f32 %v1261_v32, %v1687_v33  ;;  %v4068_v57 = vld [vmem:[#allocation31_spill] sm:$0xff] }
 0x165   :  { %v2555_v62 = vpack.c.bf16 %v1940_v60, %v1940_v60  ;;  %v2791_v19 = vpop.f32.mrf.mxu0  ;;  %v2837_v20 = vpop.f32.mrf.mxu1  ;;  %v4069_v44 = vmax.f32 %v4067_v56, %v4068_v57 }
 0x166   :  { %v2558_v63 = vpack.c.bf16 %v1943_v34, %v1943_v34  ;;  %v1941_v48 = vmax.f32 %v1898_v37, 0.0  ;;  %v1903_v36 = vadd.f32 %v3573_v24, %v1853_v35  ;;  %v1851_v6 = vmax.f32 %v4057_v3, %v1808_v47  ;;  %v4070_v34 = vld [vmem:[#allocation32_spill] sm:$0xff]  ;;  %v4071_v37 = vld [vmem:[#allocation33_spill] sm:$0xff] }
 0x167   :  { %2157 = vst.msk [vmem:[%s3921_s3 + $0x70] sm:$0xf] %vm2128_vm3, %v2555_v62  ;;  %v1811_v1 = vmax.f32 %v2791_v19, %v2837_v20  ;;  %v1264_v2 = vpop.f32.mrf.mxu0  ;;  %v1690_v9 = vpop.f32.mrf.mxu1  ;;  %v4072_v16 = vmax.f32 %v4070_v34, %v4071_v37 }
 0x168   :  { %2160 = vst.msk [vmem:[%s3921_s3 + $0x7c] sm:$0xf] %vm2128_vm3, %v2558_v63  ;;  %v2556_v22 = vpack.c.bf16 %v1941_v48, %v1941_v48  ;;  %v1946_v23 = vmax.f32 %v1903_v36, 0.0  ;;  %v1901_v50 = vadd.f32 %v3573_v24, %v1851_v6  ;;  %v1809_v51 = vmax.f32 %v1264_v2, %v1690_v9  ;;  %v4073_v48 = vld [vmem:[#allocation34_spill] sm:$0xff]  ;;  %v4074_v36 = vld [vmem:[#allocation35_spill] sm:$0xff]  ;;  %v4076_v9 = vld [vmem:[#allocation36_spill] sm:$0xff] }
 0x169   :  { %v1854_v4 = vmax.f32 %v4060_v26, %v1811_v1  ;;  %v2794_v5 = vpop.f32.mrf.mxu0  ;;  %v2840_v39 = vpop.f32.mrf.mxu1  ;;  %v4075_v55 = vmax.f32 %v4073_v48, %v4074_v36 }
 0x16a   :  { %2158 = vst.msk [vmem:[%s3921_s3 + $0x74] sm:$0xf] %vm2128_vm3, %v2556_v22  ;;  %v2561_v21 = vpack.c.bf16 %v1946_v23, %v1946_v23  ;;  %v1944_v27 = vmax.f32 %v1901_v50, 0.0  ;;  %v1852_v28 = vmax.f32 %v4063_v18, %v1809_v51  ;;  %v1814_v46 = vmax.f32 %v2794_v5, %v2840_v39  ;;  %v4077_v22 = vld [vmem:[#allocation37_spill] sm:$0xff]  ;;  %v4079_v39 = vld [vmem:[#allocation38_spill] sm:$0xff] }
 0x16b   :  { %v1904_v49 = vadd.f32 %v3573_v24, %v1854_v4  ;;  %v1277_v29 = vpop.f32.mrf.mxu0  ;;  %v1703_v30 = vpop.f32.mrf.mxu1  ;;  %v4078_v23 = vmax.f32 %v4076_v9, %v4077_v22 }
 0x16c   :  { %2163 = vst.msk [vmem:[%s3921_s3 + $0x88] sm:$0xf] %vm2128_vm3, %v2561_v21  ;;  %v2559_v40 = vpack.c.bf16 %v1944_v27, %v1944_v27  ;;  %v1902_v7 = vadd.f32 %v3573_v24, %v1852_v28  ;;  %v1857_v15 = vmax.f32 %v4066_v12, %v1814_v46  ;;  %v1812_v42 = vmax.f32 %v1277_v29, %v1703_v30  ;;  %v4080_v21 = vld [vmem:[#allocation39_spill] sm:$0xff] }
 0x16d   :  { %v1947_v43 = vmax.f32 %v1904_v49, 0.0  ;;  %v2795_v10 = vpop.f32.mrf.mxu0  ;;  %v2841_v11 = vpop.f32.mrf.mxu1  ;;  %v4081_v27 = vmax.f32 %v4079_v39, %v4080_v21  ;;  %v4084_v12 = vmax.f32 %v4082_v8, %v4083_v41 }
 0x16e   :  { %2161 = vst.msk [vmem:[%s3921_s3 + $0x80] sm:$0xf] %vm2128_vm3, %v2559_v40  ;;  %v1945_v61 = vmax.f32 %v1902_v7, 0.0  ;;  %v1907_v31 = vadd.f32 %v3573_v24, %v1857_v15  ;;  %v1855_v45 = vmax.f32 %v4069_v44, %v1812_v42  ;;  %v1815_v52 = vmax.f32 %v2795_v10, %v2841_v11 }
 0x16f   :  { %v2562_v13 = vpack.c.bf16 %v1947_v43, %v1947_v43  ;;  %v1280_v14 = vpop.f32.mrf.mxu0  ;;  %v1706_v59 = vpop.f32.mrf.mxu1 }
 0x170   :  { %v2560_v60 = vpack.c.bf16 %v1945_v61, %v1945_v61  ;;  %v1950_v32 = vmax.f32 %v1907_v31, 0.0  ;;  %v1905_v33 = vadd.f32 %v3573_v24, %v1855_v45  ;;  %v1858_v17 = vmax.f32 %v4072_v16, %v1815_v52 }
 0x171   :  { %2164 = vst.msk [vmem:[%s3921_s3 + $0x8c] sm:$0xf] %vm2128_vm3, %v2562_v13  ;;  %v1813_v0 = vmax.f32 %v1280_v14, %v1706_v59  ;;  %v2798_v35 = vpop.f32.mrf.mxu0  ;;  %v2844_v47 = vpop.f32.mrf.mxu1 }
 0x172   :  { %2162 = vst.msk [vmem:[%s3921_s3 + $0x84] sm:$0xf] %vm2128_vm3, %v2560_v60  ;;  %v2565_v62 = vpack.c.bf16 %v1950_v32, %v1950_v32  ;;  %v1948_v19 = vmax.f32 %v1905_v33, 0.0  ;;  %v1908_v20 = vadd.f32 %v3573_v24, %v1858_v17  ;;  %v1818_v63 = vmax.f32 %v2798_v35, %v2844_v47 }
 0x173   :  { %v1856_v58 = vmax.f32 %v4075_v55, %v1813_v0  ;;  %v1293_v3 = vpop.f32.mrf.mxu0  ;;  %v1719_v6 = vpop.f32.mrf.mxu1 }
 0x174   :  { %2167 = vst.msk [vmem:[%s3921_s3 + $0x98] sm:$0xf] %vm2128_vm3, %v2565_v62  ;;  %v2563_v1 = vpack.c.bf16 %v1948_v19, %v1948_v19  ;;  %v1951_v2 = vmax.f32 %v1908_v20, 0.0  ;;  %v1861_v50 = vmax.f32 %v4078_v23, %v1818_v63  ;;  %v1816_v51 = vmax.f32 %v1293_v3, %v1719_v6 }
 0x175   :  { %v1906_v38 = vadd.f32 %v3573_v24, %v1856_v58  ;;  %v2799_v25 = vpop.f32.mrf.mxu0  ;;  %v2845_v26 = vpop.f32.mrf.mxu1 }
 0x176   :  { %2165 = vst.msk [vmem:[%s3921_s3 + $0x90] sm:$0xf] %vm2128_vm3, %v2563_v1  ;;  %v2566_v4 = vpack.c.bf16 %v1951_v2, %v1951_v2  ;;  %v1911_v5 = vadd.f32 %v3573_v24, %v1861_v50  ;;  %v1859_v53 = vmax.f32 %v4081_v27, %v1816_v51 }
 0x177   :  { %v1949_v54 = vmax.f32 %v1906_v38, 0.0  ;;  %v1296_v18 = vpop.f32.mrf.mxu0  ;;  %v1722_v28 = vpop.f32.mrf.mxu1 }
 0x178   :  { %2168 = vst.msk [vmem:[%s3921_s3 + $0x9c] sm:$0xf] %vm2128_vm3, %v2566_v4  ;;  %v1954_v46 = vmax.f32 %v1911_v5, 0.0  ;;  %v1909_v49 = vadd.f32 %v3573_v24, %v1859_v53  ;;  %v1817_v29 = vmax.f32 %v1296_v18, %v1722_v28 }
 0x179   :  { %v2564_v30 = vpack.c.bf16 %v1949_v54, %v1949_v54 }
 0x17a   :  { %v2569_v40 = vpack.c.bf16 %v1954_v46, %v1954_v46  ;;  %v1952_v7 = vmax.f32 %v1909_v49, 0.0  ;;  %v1860_v15 = vmax.f32 %v4084_v12, %v1817_v29 }
 0x17b   :  { %2166 = vst.msk [vmem:[%s3921_s3 + $0x94] sm:$0xf] %vm2128_vm3, %v2564_v30 }
 0x17c   :  { %2172 = vst.msk [vmem:[%s3921_s3 + $0xa8] sm:$0x1] %vm2171_vm4, %v2569_v40  ;;  %v2567_v42 = vpack.c.bf16 %v1952_v7, %v1952_v7  ;;  %v1910_v43 = vadd.f32 %v3573_v24, %v1860_v15 }
 0x17e   :  { %2169 = vst.msk [vmem:[%s3921_s3 + $0xa0] sm:$0xf] %vm2128_vm3, %v2567_v42  ;;  %v1953_v10 = vmax.f32 %v1910_v43, 0.0 }
 0x180   :  { %v2568_v11 = vpack.c.bf16 %v1953_v10, %v1953_v10 }
 0x182   :  { %2170 = vst.msk [vmem:[%s3921_s3 + $0xa4] sm:$0xf] %vm2128_vm3, %v2568_v11 }

// kernel: my_network_forward.4
= control target key start
LH: loop header
LB: loop body
LE: loop exit
PB: predicated region body
PF: predicated region fallthrough
CT: control target
= control target key end

     0   :  { %vm81_vm0 = vcmask 1042432   ;;  %vm68_vm1 = vcmask 441344   ;;  %vm526_vm2 = vcmask 93184   ;;  %vm533_vm3 = vcmask 90112   ;;  %s868_s1 = inlined_call_operand.vmem [shape: bf16[54,12], index: 1, kind: input, shape index: {}]   ;;  %s869_s0 = inlined_call_operand.vmem [shape: bf16[4,50,54], index: 0, kind: input, shape index: {}]   ;;  %s870_s2 = inlined_call_operand.vmem [shape: f32[1,12], index: 2, kind: input, shape index: {}]   ;;  %s871_s3 = inlined_call_operand.vmem [shape: bf16[50,12], index: 3, kind: output, shape index: {}]  }
   0x1   :  { %v711_v0 = vld [vmem:[%s868_s1 + $0x18] ss:$0 sps:$4 sm:$0x77]   ;;  %v712_v1 = vld [vmem:[%s868_s1 + $0x10] sm:$0xff]   ;;  %v713_v3 = vld [vmem:[%s868_s1 + $0x8] sm:$0xff]  }
   0x2   :  { %707 = vmatprep.subr.msk.bf16.mxu0 %vm81_vm0, %v711_v0  ;;  %708 = vmatprep.subr.msk.bf16.mxu1 %vm81_vm0, %v711_v0  ;;  %v83_v2 = vsel %vm81_vm0, %v711_v0, 0  ;;  %v715_v4 = vld [vmem:[%s869_s0] sm:$0xff]   ;;  %v717_v7 = vld [vmem:[%s869_s0 + $0x8] sm:$0xff]   ;;  %v719_v9 = vld [vmem:[%s869_s0 + $0x10] sm:$0xff]  }
   0x3   :  { %644 = vmatpush3.bf16.msra.mxu0 %v83_v2  ;;  %660 = vmatpush3.bf16.msra.mxu1 %v83_v2  ;;  %v716_v5 = vld [vmem:[%s869_s0 + $0x1c] sm:$0xff]   ;;  %v718_v8 = vld [vmem:[%s869_s0 + $0x24] sm:$0xff]   ;;  %v720_v10 = vld [vmem:[%s869_s0 + $0x2c] sm:$0xff]  }
   0x4   :  { %645 = vmatprep.subr.bf16.mxu0 %v712_v1  ;;  %661 = vmatprep.subr.bf16.mxu1 %v712_v1  ;;  %v714_v6 = vld [vmem:[%s868_s1] sm:$0xff]   ;;  %v721_v11 = vld [vmem:[%s869_s0 + $0x18] ss:$0 sps:$4 sm:$0x11]   ;;  %v727_v17 = vld [vmem:[%s869_s0 + $0x48] sm:$0xff]  }
   0x5   :  { %651 = vmatprep.mubr.msk.bf16.mxu0 %vm68_vm1, %v715_v4  ;;  %667 = vmatprep.mubr.msk.bf16.mxu1 %vm68_vm1, %v716_v5  ;;  %v722_v12 = vld [vmem:[%s869_s0 + $0x34] ss:$0 sps:$4 sm:$0x11]   ;;  %v723_v13 = vld [vmem:[%s869_s0 + $0x38] sm:$0xff]   ;;  %v725_v15 = vld [vmem:[%s869_s0 + $0x40] sm:$0xff]  }
   0x6   :  { %v724_v14 = vld [vmem:[%s869_s0 + $0x54] sm:$0xff]   ;;  %v726_v16 = vld [vmem:[%s869_s0 + $0x5c] sm:$0xff]   ;;  %v728_v18 = vld [vmem:[%s869_s0 + $0x64] sm:$0xff]  }
   0x7   :  { %646 = vmatpush3.bf16.msra.mxu0 %v712_v1  ;;  %662 = vmatpush3.bf16.msra.mxu1 %v712_v1  ;;  %v729_v19 = vld [vmem:[%s869_s0 + $0x50] ss:$0 sps:$4 sm:$0x11]   ;;  %v730_v20 = vld [vmem:[%s869_s0 + $0x6c] ss:$0 sps:$4 sm:$0x11]  }
   0x8   :  { %647 = vmatprep.subr.bf16.mxu0 %v713_v3  ;;  %663 = vmatprep.subr.bf16.mxu1 %v713_v3  ;;  %v596_v41 = vld [vmem:[%s870_s2] ss:$0 sm:$0xff] }
   0xb   :  { %648 = vmatpush3.bf16.msra.mxu0 %v713_v3  ;;  %664 = vmatpush3.bf16.msra.mxu1 %v713_v3 }
   0xc   :  { %649 = vmatprep.subr.bf16.mxu0 %v714_v6  ;;  %665 = vmatprep.subr.bf16.mxu1 %v714_v6 }
   0xf   :  { %650 = vmatpush3.bf16.msra.mxu0 %v714_v6  ;;  %666 = vmatpush3.bf16.msra.mxu1 %v714_v6 }
  0x10   :  { %709 = vmatprep.subr.msk.bf16.mxu0 %vm81_vm0, %v711_v0  ;;  %710 = vmatprep.subr.msk.bf16.mxu1 %vm81_vm0, %v711_v0 }
  0x12   :  { %652 = vmatmul.mubr.msk.bf16.vlgmr.msra.gmra.mxu0 %vm68_vm1, %v717_v7  ;;  %668 = vmatmul.mubr.msk.bf16.vlgmr.msra.gmra.mxu1 %vm68_vm1, %v718_v8 }
  0x13   :  { %676 = vmatpush3.bf16.msra.mxu0 %v83_v2  ;;  %692 = vmatpush3.bf16.msra.mxu1 %v83_v2 }
  0x14   :  { %677 = vmatprep.subr.bf16.mxu0 %v712_v1  ;;  %693 = vmatprep.subr.bf16.mxu1 %v712_v1 }
  0x15   :  { %655 = vmatprep.mubr.msk.bf16.mxu0 %vm68_vm1, %v719_v9  ;;  %671 = vmatprep.mubr.msk.bf16.mxu1 %vm68_vm1, %v720_v10 }
  0x17   :  { %678 = vmatpush3.bf16.msra.mxu0 %v712_v1  ;;  %694 = vmatpush3.bf16.msra.mxu1 %v712_v1 }
  0x18   :  { %679 = vmatprep.subr.bf16.mxu0 %v713_v3  ;;  %695 = vmatprep.subr.bf16.mxu1 %v713_v3 }
  0x1a   :  { %656 = vmatmul.mubr.msk.bf16.gmra.mxu0 %vm68_vm1, %v721_v11  ;;  %672 = vmatmul.mubr.msk.bf16.gmra.mxu1 %vm68_vm1, %v722_v12 }
  0x1b   :  { %680 = vmatpush3.bf16.msra.mxu0 %v713_v3  ;;  %696 = vmatpush3.bf16.msra.mxu1 %v713_v3 }
  0x1c   :  { %681 = vmatprep.subr.bf16.mxu0 %v714_v6  ;;  %697 = vmatprep.subr.bf16.mxu1 %v714_v6 }
  0x1d   :  { %683 = vmatprep.mubr.msk.bf16.mxu0 %vm68_vm1, %v723_v13  ;;  %699 = vmatprep.mubr.msk.bf16.mxu1 %vm68_vm1, %v724_v14 }
  0x1f   :  { %682 = vmatpush3.bf16.msra.mxu0 %v714_v6  ;;  %698 = vmatpush3.bf16.msra.mxu1 %v714_v6 }
  0x22   :  { %684 = vmatmul.mubr.msk.bf16.vlgmr.msra.gmra.mxu0 %vm68_vm1, %v725_v15  ;;  %700 = vmatmul.mubr.msk.bf16.vlgmr.msra.gmra.mxu1 %vm68_vm1, %v726_v16 }
  0x23   :  { %687 = vmatprep.mubr.msk.bf16.mxu0 %vm68_vm1, %v727_v17  ;;  %703 = vmatprep.mubr.msk.bf16.mxu1 %vm68_vm1, %v728_v18 }
  0x2a   :  { %688 = vmatmul.mubr.msk.bf16.gmra.mxu0 %vm68_vm1, %v729_v19  ;;  %704 = vmatmul.mubr.msk.bf16.gmra.mxu1 %vm68_vm1, %v730_v20 }
  0xd2   :  { %v653_v21 = vpop.f32.mrf.mxu0  ;;  %v669_v22 = vpop.f32.mrf.mxu1 }
  0xd3   :  { %v457_v39 = vmax.f32 %v653_v21, %v669_v22 }
  0xd4   :  { %v119_v23 = vpop.f32.mrf.mxu0  ;;  %v221_v24 = vpop.f32.mrf.mxu1 }
  0xd5   :  { %v455_v44 = vmax.f32 %v119_v23, %v221_v24 }
  0xd6   :  { %v654_v25 = vpop.f32.mrf.mxu0  ;;  %v670_v26 = vpop.f32.mrf.mxu1 }
  0xd7   :  { %v458_v49 = vmax.f32 %v654_v25, %v670_v26 }
  0xd8   :  { %v122_v27 = vpop.f32.mrf.mxu0  ;;  %v224_v28 = vpop.f32.mrf.mxu1 }
  0xd9   :  { %v456_v53 = vmax.f32 %v122_v27, %v224_v28 }
  0xda   :  { %v657_v29 = vpop.f32.mrf.mxu0  ;;  %v673_v30 = vpop.f32.mrf.mxu1 }
  0xdb   :  { %v461_v2 = vmax.f32 %v657_v29, %v673_v30 }
  0xdc   :  { %v135_v31 = vpop.f32.mrf.mxu0  ;;  %v237_v32 = vpop.f32.mrf.mxu1 }
  0xdd   :  { %v459_v3 = vmax.f32 %v135_v31, %v237_v32 }
  0xde   :  { %v658_v33 = vpop.f32.mrf.mxu0  ;;  %v674_v34 = vpop.f32.mrf.mxu1 }
  0xe0   :  { %v832_v35 = vpop.f32.mrf.mxu0  ;;  %v834_v36 = vpop.f32.mrf.mxu1 }
  0xe1   :  { %v460_v20 = vmax.f32 %v832_v35, %v834_v36 }
  0xe2   :  { %v685_v37 = vpop.f32.mrf.mxu0  ;;  %v701_v38 = vpop.f32.mrf.mxu1 }
  0xe3   :  { %v464_v40 = vmax.f32 %v685_v37, %v701_v38 }
  0xe4   :  { %v323_v42 = vpop.f32.mrf.mxu0  ;;  %v425_v43 = vpop.f32.mrf.mxu1 }
  0xe5   :  { %v471_v45 = vmax.f32 %v457_v39, %v464_v40  ;;  %v462_v46 = vmax.f32 %v323_v42, %v425_v43 }
  0xe6   :  { %v686_v47 = vpop.f32.mrf.mxu0  ;;  %v702_v48 = vpop.f32.mrf.mxu1 }
  0xe7   :  { %v485_v50 = vadd.f32 %v596_v41, %v471_v45  ;;  %v469_v51 = vmax.f32 %v455_v44, %v462_v46  ;;  %v465_v52 = vmax.f32 %v686_v47, %v702_v48 }
  0xe8   :  { %v326_v54 = vpop.f32.mrf.mxu0  ;;  %v428_v55 = vpop.f32.mrf.mxu1 }
  0xe9   :  { %v492_v56 = vmax.f32 %v485_v50, 0.0  ;;  %v483_v57 = vadd.f32 %v596_v41, %v469_v51  ;;  %v472_v58 = vmax.f32 %v458_v49, %v465_v52  ;;  %v463_v59 = vmax.f32 %v326_v54, %v428_v55 }
  0xea   :  { %v689_v60 = vpop.f32.mrf.mxu0  ;;  %v705_v61 = vpop.f32.mrf.mxu1 }
  0xeb   :  { %v606_v62 = vpack.c.bf16 %v492_v56, %v492_v56  ;;  %v490_v63 = vmax.f32 %v483_v57, 0.0  ;;  %v486_v0 = vadd.f32 %v596_v41, %v472_v58  ;;  %v470_v1 = vmax.f32 %v456_v53, %v463_v59 }
  0xec   :  { %v468_v4 = vmax.f32 %v689_v60, %v705_v61  ;;  %v339_v5 = vpop.f32.mrf.mxu0  ;;  %v441_v6 = vpop.f32.mrf.mxu1 }
  0xed   :  { %529 = vst.msk [vmem:[%s871_s3 + $0x8] sm:$0xf] %vm526_vm2, %v606_v62  ;;  %v604_v7 = vpack.c.bf16 %v490_v63, %v490_v63  ;;  %v493_v8 = vmax.f32 %v486_v0, 0.0  ;;  %v484_v9 = vadd.f32 %v596_v41, %v470_v1  ;;  %v466_v10 = vmax.f32 %v339_v5, %v441_v6 }
  0xee   :  { %v475_v11 = vmax.f32 %v461_v2, %v468_v4  ;;  %v690_v12 = vpop.f32.mrf.mxu0  ;;  %v706_v13 = vpop.f32.mrf.mxu1 }
  0xef   :  { %527 = vst.msk [vmem:[%s871_s3] sm:$0xf] %vm526_vm2, %v604_v7  ;;  %v607_v14 = vpack.c.bf16 %v493_v8, %v493_v8  ;;  %v491_v15 = vmax.f32 %v484_v9, 0.0  ;;  %v473_v16 = vmax.f32 %v459_v3, %v466_v10 }
  0xf0   :  { %v489_v17 = vadd.f32 %v596_v41, %v475_v11  ;;  %v342_v18 = vpop.f32.mrf.mxu0  ;;  %v444_v19 = vpop.f32.mrf.mxu1 }
  0xf1   :  { %530 = vst.msk [vmem:[%s871_s3 + $0xc] sm:$0xf] %vm526_vm2, %v607_v14  ;;  %v605_v21 = vpack.c.bf16 %v491_v15, %v491_v15  ;;  %v487_v22 = vadd.f32 %v596_v41, %v473_v16  ;;  %v467_v23 = vmax.f32 %v342_v18, %v444_v19 }
  0xf2   :  { %v496_v24 = vmax.f32 %v489_v17, 0.0 }
  0xf3   :  { %528 = vst.msk [vmem:[%s871_s3 + $0x4] sm:$0xf] %vm526_vm2, %v605_v21  ;;  %v494_v25 = vmax.f32 %v487_v22, 0.0  ;;  %v474_v26 = vmax.f32 %v460_v20, %v467_v23 }
  0xf4   :  { %v610_v27 = vpack.c.bf16 %v496_v24, %v496_v24 }
  0xf5   :  { %v608_v28 = vpack.c.bf16 %v494_v25, %v494_v25  ;;  %v488_v29 = vadd.f32 %v596_v41, %v474_v26 }
  0xf6   :  { %534 = vst.msk [vmem:[%s871_s3 + $0x18] sm:$0x1] %vm533_vm3, %v610_v27 }
  0xf7   :  { %531 = vst.msk [vmem:[%s871_s3 + $0x10] sm:$0xf] %vm526_vm2, %v608_v28  ;;  %v495_v30 = vmax.f32 %v488_v29, 0.0 }
  0xf9   :  { %v609_v31 = vpack.c.bf16 %v495_v30, %v495_v30 }
  0xfb   :  { %532 = vst.msk [vmem:[%s871_s3 + $0x14] sm:$0xf] %vm526_vm2, %v609_v31 }

// kernel: my_network_forward.5
= control target key start
LH: loop header
LB: loop body
LE: loop exit
PB: predicated region body
PF: predicated region fallthrough
CT: control target
= control target key end

     0   :  { %v906_v2 = vmov 0   ;;  %v75_v10 = vlaneseq  ;;  %v907_v11 = vmov 1966171168   ;;  %vm303_vm0 = vcmask 1045504   ;;  %s1162_s0 = inlined_call_operand.vmem [shape: bf16[2,300], index: 0, kind: input, shape index: {}]   ;;  %s1163_s1 = inlined_call_operand.vmem [shape: bf16[300,140], index: 1, kind: input, shape index: {}]   ;;  %s1164_s2 = inlined_call_operand.vmem [shape: f32[1,140], index: 2, kind: input, shape index: {}]   ;;  %s1165_s3 = inlined_call_operand.vmem [shape: bf16[140,80], index: 3, kind: input, shape index: {}]   ;;  %s1166_s4 = inlined_call_operand.vmem [shape: f32[1,80], index: 4, kind: input, shape index: {}]   ;;  %s1167_s5 = inlined_call_operand.vmem [shape: bf16[80,40], index: 5, kind: input, shape index: {}]   ;;  %s1168_s6 = inlined_call_operand.vmem [shape: f32[1,40], index: 6, kind: input, shape index: {}]   ;;  %s1169_s7 = inlined_call_operand.vmem [shape: bf16[40,10], index: 7, kind: input, shape index: {}]   ;;  %s1170_s8 = inlined_call_operand.vmem [shape: f32[1,10], index: 8, kind: input, shape index: {}]   ;;  %s1171_s9 = inlined_call_operand.hbm [shape: f32[2,10], index: 9, kind: output, shape index: {}]  }
   0x1   :  { %v810_v0 = vld [vmem:[%s1163_s1 + $0x74] ss:$8 sps:$4 sm:$0xff]   ;;  %v812_v1 = vld [vmem:[%s1163_s1 + $0x70] ss:$8 sps:$4 sm:$0xff]   ;;  %383 = vmatprep.mubr.bf16.mxu1 %v906_v2  ;;  %v813_v3 = vld [vmem:[%s1163_s1 + $0x64] ss:$8 sps:$4 sm:$0xff]   ;;  %v95_v12 = vunpack.c.l.s4 %v907_v11 }
   0x2   :  { %310 = vmatprep.subr.bf16.mxu0 %v810_v0  ;;  %v815_v4 = vld [vmem:[%s1163_s1 + $0x60] ss:$8 sps:$4 sm:$0xff]   ;;  %v816_v5 = vld [vmem:[%s1163_s1 + $0x54] ss:$8 sps:$4 sm:$0xff]   ;;  %v818_v6 = vld [vmem:[%s1163_s1 + $0x50] ss:$8 sps:$4 sm:$0xff]  }
   0x3   :  { %311 = vmatpush1.bf16.msra.mxu0 %v812_v1  ;;  %v819_v7 = vld [vmem:[%s1163_s1 + $0x44] ss:$8 sps:$4 sm:$0xff]   ;;  %v821_v8 = vld [vmem:[%s1163_s1 + $0x40] ss:$8 sps:$4 sm:$0xff]   ;;  %v822_v9 = vld [vmem:[%s1163_s1 + $0x34] ss:$8 sps:$4 sm:$0xff]   ;;  %v96_v18 = vunpack.c.0.s8 %v95_v12 }
   0x4   :  { %312 = vmatprep.subr.bf16.mxu0 %v813_v3  ;;  %v824_v13 = vld [vmem:[%s1163_s1 + $0x30] ss:$8 sps:$4 sm:$0xff]   ;;  %v825_v14 = vld [vmem:[%s1163_s1 + $0x24] ss:$8 sps:$4 sm:$0xff]   ;;  %v1001_v17 = vshrl.u32 %v75_v10, 7  ;;  %vm299_vm1 = vcmask 359424  }
   0x5   :  { %v848_v15 = vld [vmem:[%s1163_s1 + $0x124] ss:$8 sps:$4 sm:$0x3f]   ;;  %v851_v16 = vld [vmem:[%s1163_s1 + $0x120] ss:$8 sps:$4 sm:$0x3f]  }
   0x6   :  { %v827_v19 = vld [vmem:[%s1163_s1 + $0x20] ss:$8 sps:$4 sm:$0xff]   ;;  %746 = vmatprep.subr.msk.bf16.mxu1 %vm303_vm0, %v848_v15  ;;  %v828_v20 = vld [vmem:[%s1163_s1 + $0x14] ss:$8 sps:$4 sm:$0xff]   ;;  %v305_v21 = vsel %vm303_vm0, %v851_v16, 0  ;;  %v99_v24 = vsub.s32 %v96_v18, %v1001_v17 }
   0x7   :  { %313 = vmatpush1.bf16.msra.mxu0 %v815_v4  ;;  %v854_v22 = vld [vmem:[%s1163_s1 + $0x114] ss:$8 sps:$4 sm:$0xff]   ;;  %362 = vmatpush1.bf16.msra.mxu1 %v305_v21  ;;  %v857_v23 = vld [vmem:[%s1163_s1 + $0x110] ss:$8 sps:$4 sm:$0xff]   ;;  %v860_v26 = vld [vmem:[%s1163_s1 + $0x104] ss:$8 sps:$4 sm:$0xff]  }
   0x8   :  { %314 = vmatprep.subr.bf16.mxu0 %v816_v5  ;;  %363 = vmatprep.subr.bf16.mxu1 %v854_v22  ;;  %v830_v25 = vld [vmem:[%s1163_s1 + $0x10] ss:$8 sps:$4 sm:$0xff]   ;;  %v831_v27 = vld [vmem:[%s1163_s1 + $0x4] ss:$8 sps:$4 sm:$0xff]   ;;  %v863_v28 = vld [vmem:[%s1163_s1 + $0x100] ss:$8 sps:$4 sm:$0xff]  }
   0x9   :  { %v707_v29 = vld.sshfl [vmem:[%s1162_s0] sm:$0x13 pattern:$0x75316420]  ;;  %v834_v33 = vld [vmem:[%s1163_s1 + $0xf4] ss:$8 sps:$4 sm:$0xff]  }
   0xa   :  { %v100_v30 = vrot.slane %v707_v29, %v99_v24  ;;  %v93_v31 = vcombine.high %v707_v29, %v707_v29  ;;  %v833_v32 = vld [vmem:[%s1163_s1] ss:$8 sps:$4 sm:$0xff]   ;;  %v836_v36 = vld [vmem:[%s1163_s1 + $0xf0] ss:$8 sps:$4 sm:$0xff]   ;;  %v837_v38 = vld [vmem:[%s1163_s1 + $0xe4] ss:$8 sps:$4 sm:$0xff]  }
   0xb   :  { %315 = vmatpush1.bf16.msra.mxu0 %v818_v6  ;;  %364 = vmatpush1.bf16.msra.mxu1 %v857_v23  ;;  %v867_v37 = vld [vmem:[%s1165_s3 + $0x38] sm:$0xff]   ;;  %v868_v39 = vld [vmem:[%s1165_s3 + $0x30] sm:$0xff]   ;;  %v839_v40 = vld [vmem:[%s1163_s1 + $0xe0] ss:$8 sps:$4 sm:$0xff]  }
   0xc   :  { %316 = vmatprep.subr.bf16.mxu0 %v819_v7  ;;  %365 = vmatprep.subr.bf16.mxu1 %v860_v26  ;;  %v108_v34 = vcombine.high %v100_v30, %v100_v30  ;;  %v107_v35 = vrot.slane %v93_v31, %v99_v24  ;;  %v840_v41 = vld [vmem:[%s1163_s1 + $0xd4] ss:$8 sps:$4 sm:$0xff]   ;;  %v869_v42 = vld [vmem:[%s1165_s3 + $0x28] sm:$0xff]  }
   0xe   :  { %342 = vmatprep.mubr.bf16.mxu0 %v107_v35 }
   0xf   :  { %317 = vmatpush1.bf16.msra.mxu0 %v821_v8  ;;  %366 = vmatpush1.bf16.msra.mxu1 %v863_v28 }
  0x10   :  { %318 = vmatprep.subr.bf16.mxu0 %v822_v9  ;;  %481 = vmatprep.subr.bf16.mxu1 %v906_v2 }
  0x12   :  { %747 = vmatmul.mubr.msk.bf16.vlgmr.msra.gmra.mxu1 %vm299_vm1, %v108_v34 }
  0x13   :  { %319 = vmatpush1.bf16.msra.mxu0 %v824_v13  ;;  %482 = vmatpush1.bf16.msra.mxu1 %v867_v37 }
  0x14   :  { %320 = vmatprep.subr.bf16.mxu0 %v825_v14  ;;  %483 = vmatprep.subr.bf16.mxu1 %v906_v2 }
  0x17   :  { %321 = vmatpush1.bf16.msra.mxu0 %v827_v19  ;;  %484 = vmatpush1.bf16.msra.mxu1 %v868_v39 }
  0x18   :  { %322 = vmatprep.subr.bf16.mxu0 %v828_v20  ;;  %485 = vmatprep.subr.bf16.mxu1 %v906_v2 }
  0x1b   :  { %323 = vmatpush1.bf16.msra.mxu0 %v830_v25 }
  0x1c   :  { %324 = vmatprep.subr.bf16.mxu0 %v831_v27 }
  0x1f   :  { %325 = vmatpush1.bf16.msra.mxu0 %v833_v32 }
  0x20   :  { %326 = vmatprep.subr.bf16.mxu0 %v834_v33 }
  0x23   :  { %327 = vmatpush2.bf16.msra.mxu0 %v836_v36 }
  0x24   :  { %328 = vmatprep.subr.bf16.mxu0 %v837_v38 }
  0x25   :  { %14 = vsyncpa [#allocation3], 0  ;;  %v842_v43 = vld [vmem:[%s1163_s1 + $0xd0] ss:$8 sps:$4 sm:$0xff]   ;;  %v843_v44 = vld [vmem:[%s1163_s1 + $0xc4] ss:$8 sps:$4 sm:$0xff]   ;;  %486 = vmatpush1.bf16.msra.mxu1 %v869_v42 }
  0x26   :  { %v870_v45 = vld [vmem:[%s1165_s3 + $0x20] sm:$0xff]   ;;  %487 = vmatprep.subr.bf16.mxu1 %v906_v2  ;;  %v846_v47 = vld [vmem:[%s1163_s1 + $0xb4] ss:$8 sps:$4 sm:$0xff]   ;;  %v850_v49 = vld [vmem:[%s1163_s1 + $0xb0] ss:$8 sps:$4 sm:$0xff]   ;;  %v908_v61 = vmov 0.0  }
  0x27   :  { %329 = vmatpush2.bf16.msra.mxu0 %v839_v40  ;;  %v845_v46 = vld [vmem:[%s1163_s1 + $0xc0] ss:$8 sps:$4 sm:$0xff]   ;;  %v871_v48 = vld [vmem:[%s1165_s3 + $0x18] sm:$0xff]   ;;  %v852_v50 = vld [vmem:[%s1163_s1 + $0xa4] ss:$8 sps:$4 sm:$0xff]   ;;  %v77_v3 = vsub.s32 0, %v1001_v17 }
  0x28   :  { %330 = vmatprep.subr.bf16.mxu0 %v840_v41  ;;  %v856_v51 = vld [vmem:[%s1163_s1 + $0xa0] ss:$8 sps:$4 sm:$0xff]   ;;  %v858_v52 = vld [vmem:[%s1163_s1 + $0x94] ss:$8 sps:$4 sm:$0xff]   ;;  %v862_v53 = vld [vmem:[%s1163_s1 + $0x90] ss:$8 sps:$4 sm:$0xff]  }
  0x29   :  { %488 = vmatpush1.bf16.msra.mxu1 %v870_v45  ;;  %v864_v54 = vld [vmem:[%s1163_s1 + $0x84] ss:$8 sps:$4 sm:$0xff]   ;;  %v866_v55 = vld [vmem:[%s1163_s1 + $0x80] ss:$8 sps:$4 sm:$0xff]   ;;  %v872_v56 = vld [vmem:[%s1165_s3 + $0x10] sm:$0xff]   ;;  %v81_v4 = vsub.s32 1, %v1001_v17 }
  0x2a   :  { %489 = vmatprep.subr.bf16.mxu1 %v906_v2  ;;  %v873_v57 = vld [vmem:[%s1165_s3 + $0x8] sm:$0xff]   ;;  %v874_v58 = vld [vmem:[%s1165_s3] sm:$0xff]   ;;  %vm474_vm2 = vcmask 97280   ;;  %v877_v17 = vld [vmem:[%s1167_s5 + $0x18] sm:$0xff]   ;;  %vm909_vm3 = vmmov 0   ;;  %vm647_vm4 = vcmask 1043456  }
  0x2b   :  { %331 = vmatpush2.bf16.msra.mxu0 %v842_v43  ;;  %v875_v59 = vld [vmem:[%s1165_s3 + $0x40] sm:$0x3f]   ;;  %v878_v21 = vld [vmem:[%s1167_s5 + $0x10] sm:$0xff]   ;;  %v879_v22 = vld [vmem:[%s1167_s5 + $0x8] sm:$0xff]   ;;  %vm570_vm5 = vcmask 654336   ;;  %vm643_vm6 = vcmask 326656  }
  0x2c   :  { %332 = vmatprep.subr.bf16.mxu0 %v843_v44  ;;  %v479_v60 = vsel %vm303_vm0, %v875_v59, 0  ;;  %v876_v19 = vld [vmem:[%s1167_s5 + $0x20] sm:$0xff]   ;;  %v881_v24 = vld [vmem:[%s1169_s7 + $0x10] ss:$0 sps:$4 sm:$0xff]   ;;  %v882_v34 = vld [vmem:[%s1169_s7 + $0x8] sm:$0xff]   ;;  %s910_s16 = smov [#allocation2]  }
  0x2d   :  { %490 = vmatpush1.bf16.msra.mxu1 %v871_v48  ;;  %v880_v23 = vld [vmem:[%s1167_s5] sm:$0xff]   ;;  %v649_v25 = vsel %vm647_vm4, %v881_v24, 0  ;;  %vm691_vm7 = vcmask 74752  }
  0x2e   :  { %491 = vmatprep.subr.bf16.mxu1 %v906_v2  ;;  %v748_v26 = vld [vmem:[%s1166_s4] ss:$0 sm:$0xff] }
  0x2f   :  { %333 = vmatpush2.bf16.msra.mxu0 %v845_v46  ;;  %v883_v35 = vld [vmem:[%s1169_s7] sm:$0xff]   ;;  %s699_s7 = sshll.u32 %s910_s16, 4  ;;  %s700_s7 = int_to_ptr.vmem [resolvable:$true] %s699_s7 }
  0x30   :  { %334 = vmatprep.subr.bf16.mxu0 %v846_v47  ;;  %v759_v36 = vld [vmem:[%s1168_s6] ss:$0 sm:$0xff]  ;;  %s884_s6 = scalar_lea.vmem %s700_s7, 32  ;;  %p889_p1 = scmp.lt.s32.totalorder %s700_s7, %s700_s7 }
  0x31   :  { %492 = vmatpush1.bf16.msra.mxu1 %v872_v56  ;;  %v766_v44 = vld [vmem:[%s1170_s8] ss:$0 sm:$0xff]  ;;  %p885_p0 = scmp.ne.s32.totalorder %s700_s7, %s884_s6  ;;  %p890_p2 = scmp.lt.s32.totalorder %s884_s6, %s884_s6 }
  0x32   :  { %493 = vmatprep.subr.bf16.mxu1 %v906_v2 }
  0x33   :  { %335 = vmatpush2.bf16.msra.mxu0 %v850_v49  ;;  %p891_p3 = por %p890_p2, %p889_p1 }
  0x34   :  { %336 = vmatprep.subr.bf16.mxu0 %v852_v50 }
  0x35   :  { %494 = vmatpush1.bf16.msra.mxu1 %v873_v57  ;;  %p892_p4 = pnand %p891_p3, %p885_p0 }
  0x36   :  { %495 = vmatprep.subr.bf16.mxu1 %v906_v2 }
  0x37   :  { %337 = vmatpush2.bf16.msra.mxu0 %v856_v51 }
  0x38   :  { %338 = vmatprep.subr.bf16.mxu0 %v858_v52 }
  0x39   :  { %496 = vmatpush1.bf16.msra.mxu1 %v874_v58 }
  0x3a   :  { %511 = vmatprep.subr.bf16.mxu1 %v906_v2  ;;  %v73_v2 = vld [vmem:[%s1164_s2] sm:$0x3] }
  0x3b   :  { %339 = vmatpush2.bf16.msra.mxu0 %v862_v53  ;;  %v78_v5 = vrot.slane %v73_v2, %v77_v3  ;;  %v82_v6 = vrot.slane %v73_v2, %v81_v4 }
  0x3c   :  { %340 = vmatprep.subr.bf16.mxu0 %v864_v54 }
  0x3d   :  { %512 = vmatpush2.bf16.msra.mxu1 %v479_v60 }
  0x3e   :  { %781 = vmatprep.subr.bf16.mxu1 %v908_v61 }
  0x3f   :  { %341 = vmatpush2.bf16.msra.mxu0 %v866_v55 }
  0x40   :  { %795 = vmatprep.subr.bf16.mxu0 %v908_v61 }
  0x42   :  { %343 = vmatmul.mubr.bf16.vlgmr.msra.gmra.mxu0 %v100_v30 }
  0x43   :  { %801 = vmatprep.mubr.msk.bf16.mxu0 %vm909_vm3, %v908_v61  ;;  %796 = vmatpush3.bf16.msra.mxu0 %v649_v25 }
  0x44   :  { %797 = vmatprep.subr.bf16.mxu0 %v908_v61 }
  0x47   :  { %798 = vmatpush3.bf16.msra.mxu0 %v882_v34 }
  0x48   :  { %799 = vmatprep.subr.bf16.mxu0 %v908_v61 }
  0x4b   :  { %800 = vmatpush3.bf16.msra.mxu0 %v883_v35 }
  0xd2   :  { %v385_v62 = vpop.f32.mrf.mxu1 }
  0xd4   :  { %v387_v63 = vpop.f32.mrf.mxu1 }
  0xd6   :  { %v389_v0 = vpop.f32.mrf.mxu1 }
  0xd8   :  { %v390_v1 = vpop.f32.mrf.mxu1 }
 0x102   :  { %v344_v7 = vpop.f32.mrf.mxu0 }
 0x103   :  { %v345_v8 = vadd.f32 %v344_v7, %v78_v5 }
 0x104   :  { %v346_v9 = vpop.f32.mrf.mxu0 }
 0x105   :  { %v386_v10 = vadd.f32 %v385_v62, %v345_v8  ;;  %v347_v11 = vadd.f32 %v346_v9, %v82_v6 }
 0x106   :  { %v348_v12 = vpop.f32.mrf.mxu0 }
 0x107   :  { %v388_v13 = vadd.f32 %v387_v63, %v347_v11  ;;  %v392_v14 = vmax.f32 %v386_v10, 0.0 }
 0x108   :  { %v349_v15 = vpop.f32.mrf.mxu0 }
 0x109   :  { %v393_v16 = vmax.f32 %v388_v13, 0.0  ;;  %v394_v20 = vpack.c.bf16 %v392_v14, %v392_v14 }
 0x10b   :  { %v395_v18 = vpack.c.bf16 %v393_v16, %v393_v16 }
 0x10d   :  { %758 = vmatprep.mubr.msk.bf16.mxu1 %vm474_vm2, %v395_v18 }
 0x10e   :  { %514 = vmatmul.mubr.bf16.vlgmr.msra.gmra.mxu1 %v394_v20 }
 0x10f   :  { %782 = vmatpush3.bf16.msra.mxu1 %v876_v19  ;;  %791 = vmatprep.mubr.msk.bf16.mxu1 %vm909_vm3, %v908_v61 }
 0x110   :  { %783 = vmatprep.subr.bf16.mxu1 %v908_v61 }
 0x113   :  { %784 = vmatpush3.bf16.msra.mxu1 %v877_v17 }
 0x114   :  { %785 = vmatprep.subr.bf16.mxu1 %v908_v61 }
 0x117   :  { %786 = vmatpush3.bf16.msra.mxu1 %v878_v21 }
 0x118   :  { %787 = vmatprep.subr.bf16.mxu1 %v908_v61 }
 0x11b   :  { %788 = vmatpush3.bf16.msra.mxu1 %v879_v22 }
 0x11c   :  { %789 = vmatprep.subr.bf16.mxu1 %v908_v61 }
 0x11f   :  { %790 = vmatpush3.bf16.msra.mxu1 %v880_v23 }
 0x1ce   :  { %v515_v27 = vpop.f32.mrf.mxu1 }
 0x1cf   :  { %v516_v28 = vadd.f32 %v748_v26, %v515_v27 }
 0x1d0   :  { %v517_v29 = vpop.f32.mrf.mxu1 }
 0x1d1   :  { %v521_v30 = vmax.f32 %v516_v28, 0.0 }
 0x1d2   :  { %v518_v31 = vpop.f32.mrf.mxu1 }
 0x1d3   :  { %v522_v32 = vpack.c.bf16 %v521_v30, %v521_v30 }
 0x1d4   :  { %v519_v33 = vpop.f32.mrf.mxu1 }
 0x1d5   :  { %792 = vmatmul.mubr.msk.bf16.vlgmr.msra.gmra.mxu1 %vm570_vm5, %v522_v32 }
 0x295   :  { %v608_v37 = vpop.f32.mrf.mxu1 }
 0x296   :  { %v609_v38 = vadd.f32 %v759_v36, %v608_v37 }
 0x297   :  { %v793_v39 = vpop.f32.mrf.mxu1 }
 0x298   :  { %v614_v40 = vmax.f32 %v609_v38, 0.0 }
 0x299   :  { %v611_v41 = vpop.f32.mrf.mxu1 }
 0x29a   :  { %v615_v42 = vpack.c.bf16 %v614_v40, %v614_v40 }
 0x29b   :  { %v794_v43 = vpop.f32.mrf.mxu1 }
 0x29c   :  { %802 = vmatmul.mubr.msk.bf16.vlgmr.msra.gmra.mxu0 %vm643_vm6, %v615_v42 }
 0x35c   :  { %v685_v45 = vpop.f32.mrf.mxu0 }
 0x35d   :  { %v686_v46 = vadd.f32 %v766_v44, %v685_v45 }
 0x35e   :  { %v803_v47 = vpop.f32.mrf.mxu0 }
 0x35f   :  { %692 = vst.msk [vmem:[#allocation2] sm:$0x3] %vm691_vm7, %v686_v46 }
 0x360   :  { %v688_v48 = vpop.f32.mrf.mxu0 }
 0x361   :  { %895 = shalt.err (!%p892_p4)
}
 0x362   :  { %702 = dma.vmem_to_hbm [thread:$0]  %s700_s7, 32, %s1171_s9, [#allocation3]   ;;  %v804_v49 = vpop.f32.mrf.mxu0 }
 0x363   :  { %904 = dma.done.wait [#allocation3], 32  }
 0x364   :  { %905 = vsyncadd [#allocation3], 4294967264 }
 0x365   :  { %706 = vsyncpa [#allocation3], 1 }

</bundles_post_ra>
